<compile_context>
chip_gen: v7x
topology: tpu7x:2x2x1
jax: 0.10.0
libtpu: 0.0.40
codegen_flags: <defaults>
</compile_context>

<pallas_src>
import math
from functools import partial

import jax
import jax.numpy as jnp
from jax import lax
from jax.experimental import pallas as pl
from jax.experimental.pallas import tpu as pltpu

LANE = 128      # vreg lane width
SUBLANE = 8     # vreg sublane count (f32)


def _round_up(x, m):
    return (x + m - 1) // m * m


# ------------------------------ fused kernel ---------------------------------
def _fused_lstm_head_kernel(
    x_ref,              # (T*BP, H)   f32, time-major padded input sequence
    wih_ref,            # (L, H, G4)  bf16, input->gate weights (packed gates)
    whh_ref,            # (L, H, G4)  bf16, hidden->gate weights (packed gates)
    b_ref,              # (L, 1, G4)  f32, b_ih + b_hh
    hw0_ref, hb0_ref,   # (H, LIN) bf16, (1, LIN) f32
    hw1_ref, hb1_ref,   # (LIN, LIN) bf16, (1, LIN) f32
    hw2_ref, hb2_ref,   # (LIN, OUT) bf16, (1, OUT) f32
    out_ref,            # (B, OUT)    f32
    seq_scr,            # (T*BP, H)   f32, per-layer output sequence (next in)
    xg_scr,             # (T*BP, G4)  f32, hoisted input projections
    *, T, BP):
    H = whh_ref.shape[1]
    G4 = whh_ref.shape[2]
    L = wih_ref.shape[0]

    # Lane mask selecting the "g" gate block inside the packed [i|f|g|o] vreg.
    # Computed once (hoisted out of layer/time loops).
    lane = lax.broadcasted_iota(jnp.int32, (BP, G4), 1)
    g_mask = (lane >= 2 * H) & (lane < 3 * H)

    h_last = None
    for l in range(L):                       # static unroll over layers
        # Hoist the input projection (and bias) for all timesteps off the
        # serial recurrence path: one big matmul instead of one per step.
        src = x_ref[...] if l == 0 else seq_scr[...]
        xg_scr[...] = (
            jnp.dot(src.astype(jnp.bfloat16), wih_ref[l],
                    preferred_element_type=jnp.float32)
            + b_ref[l])

        whh_l = whh_ref[l]                   # (H, G4) bf16, kept in vregs
        write_seq = (l < L - 1)              # static; last layer skips writes

        def step(t, carry, whh_l=whh_l, write_seq=write_seq):
            h, c = carry                     # (BP, H) f32 each, value-carried
            off = pl.multiple_of(t * BP, BP)
            z = xg_scr[pl.ds(off, BP), :] + jnp.dot(
                h.astype(jnp.bfloat16), whh_l,
                preferred_element_type=jnp.float32)
            # tanh(x) == 2*sigmoid(2x) - 1: a single transcendental pass over
            # the whole packed gate vreg, gate selection via lane mask (VPU).
            zz = jnp.where(g_mask, 2.0 * z, z)
            s = jax.nn.sigmoid(zz)
            act = jnp.where(g_mask, 2.0 * s - 1.0, s)
            i_g = act[:, 0 * H:1 * H]
            f_g = act[:, 1 * H:2 * H]
            g_g = act[:, 2 * H:3 * H]
            o_g = act[:, 3 * H:4 * H]
            c_new = f_g * c + i_g * g_g
            h_new = o_g * jnp.tanh(c_new)
            if write_seq:
                seq_scr[pl.ds(off, BP), :] = h_new
            return h_new, c_new

        h0 = jnp.zeros((BP, H), jnp.float32)
        c0 = jnp.zeros((BP, H), jnp.float32)
        h_last, _ = lax.fori_loop(0, T, step, (h0, c0), unroll=True)

    # ---- ReLU + fc -> fc1 -> fc2 head on the last layer's final hidden state
    y = jnp.maximum(h_last, 0.0)
    y = jnp.dot(y.astype(jnp.bfloat16), hw0_ref[...],
                preferred_element_type=jnp.float32) + hb0_ref[...]
    y = jnp.dot(y.astype(jnp.bfloat16), hw1_ref[...],
                preferred_element_type=jnp.float32) + hb1_ref[...]
    y = jnp.dot(y.astype(jnp.bfloat16), hw2_ref[...],
                preferred_element_type=jnp.float32) + hb2_ref[...]
    B = out_ref.shape[0]
    out_ref[...] = y[:B, :].astype(out_ref.dtype)


# --------------------------------- wrapper ------------------------------------
def _full_spec(shape):
    zeros = (0,) * len(shape)
    return pl.BlockSpec(shape, lambda i: zeros)


def regression_lstm_forward(x_bti, kp):
    """x_bti: (B, T, num_sensors) batch-first, same as the PyTorch module."""
    B, T, I = x_bti.shape
    L, H, G4 = kp["whh"].shape
    OUT = kp["hw2"].shape[1]
    BP = _round_up(B, SUBLANE)
    assert I <= H and H % SUBLANE == 0, "num_sensors must fit in hidden width"

    # time-major, batch padded to 8 sublanes, feature padded (with zeros) to H
    x_p = jnp.zeros((T, BP, H), jnp.float32)
    x_p = x_p.at[:, :B, :I].set(
        jnp.transpose(x_bti, (1, 0, 2)).astype(jnp.float32))
    x_p = x_p.reshape(T * BP, H)

    kernel = partial(_fused_lstm_head_kernel, T=T, BP=BP)

    return pl.pallas_call(
        kernel,
        out_shape=jax.ShapeDtypeStruct((B, OUT), jnp.float32),
        grid=(1,),
        in_specs=[
            _full_spec(x_p.shape),
            _full_spec(kp["wih"].shape),
            _full_spec(kp["whh"].shape),
            _full_spec(kp["b"].shape),
            _full_spec(kp["hw0"].shape), _full_spec(kp["hb0"].shape),
            _full_spec(kp["hw1"].shape), _full_spec(kp["hb1"].shape),
            _full_spec(kp["hw2"].shape), _full_spec(kp["hb2"].shape),
        ],
        out_specs=pl.BlockSpec((B, OUT), lambda i: (0, 0)),
        scratch_shapes=[
            pltpu.VMEM((T * BP, H), jnp.float32),    # per-layer output sequence
            pltpu.VMEM((T * BP, G4), jnp.float32),   # hoisted input projections
        ],
        compiler_params=pltpu.CompilerParams(
            dimension_semantics=("arbitrary",),
            vmem_limit_bytes=32 * 1024 * 1024),
    )(x_p, kp["wih"], kp["whh"], kp["b"],
      kp["hw0"], kp["hb0"], kp["hw1"], kp["hb1"], kp["hw2"], kp["hb2"])


# --------------------------- parameter creation --------------------------------
def init_raw_params(key, num_sensors, hidden, num_layers, lin_layers, t_out):
    """PyTorch-layout params (w_ih: (4H, in), w_hh: (4H, H), gate order i,f,g,o)."""
    params = {"lstm": []}
    k = 1.0 / math.sqrt(hidden)
    for layer in range(num_layers):
        in_size = num_sensors if layer == 0 else hidden
        key, k1, k2, k3, k4 = jax.random.split(key, 5)
        params["lstm"].append({
            "w_ih": jax.random.uniform(k1, (4 * hidden, in_size), jnp.float32, -k, k),
            "w_hh": jax.random.uniform(k2, (4 * hidden, hidden), jnp.float32, -k, k),
            "b_ih": jax.random.uniform(k3, (4 * hidden,), jnp.float32, -k, k),
            "b_hh": jax.random.uniform(k4, (4 * hidden,), jnp.float32, -k, k),
        })

    def linear(key, fan_in, fan_out):
        kk = 1.0 / math.sqrt(fan_in)
        k1, k2 = jax.random.split(key)
        w = jax.random.uniform(k1, (fan_out, fan_in), jnp.float32, -kk, kk)
        b = jax.random.uniform(k2, (fan_out,), jnp.float32, -kk, kk)
        return w, b

    key, k0, k1_, k2_ = jax.random.split(key, 4)
    params["w0"], params["b0"] = linear(k0, hidden, lin_layers)
    params["w1"], params["b1"] = linear(k1_, lin_layers, lin_layers)
    params["w2"], params["b2"] = linear(k2_, lin_layers, t_out)
    return params


def pack_params(raw, num_sensors, hidden, lin_layers, t_out):
    """Fuse PyTorch-layout params into the packed-gate, bf16 kernel layout."""
    H = hidden
    G4 = _round_up(4 * H, LANE)          # packed gates, lane-padded at the end
    L = len(raw["lstm"])

    wih = jnp.zeros((L, H, G4), jnp.float32)
    whh = jnp.zeros((L, H, G4), jnp.float32)
    b = jnp.zeros((L, 1, G4), jnp.float32)
    for l, lay in enumerate(raw["lstm"]):
        in_size = lay["w_ih"].shape[1]
        # PyTorch gate order along the 4H axis is already [i|f|g|o] contiguous.
        wih = wih.at[l, :in_size, :4 * H].set(lay["w_ih"].T)
        whh = whh.at[l, :H, :4 * H].set(lay["w_hh"].T)
        b = b.at[l, 0, :4 * H].set(lay["b_ih"] + lay["b_hh"])

    return {
        "wih": wih.astype(jnp.bfloat16),
        "whh": whh.astype(jnp.bfloat16),
        "b": b,                                          # bias stays f32
        "hw0": raw["w0"].T.astype(jnp.bfloat16),
        "hb0": raw["b0"][None, :].astype(jnp.float32),
        "hw1": raw["w1"].T.astype(jnp.bfloat16),
        "hb1": raw["b1"][None, :].astype(jnp.float32),
        "hw2": raw["w2"].T.astype(jnp.bfloat16),
        "hb2": raw["b2"][None, :].astype(jnp.float32),
    }


# ------------------------------ pure-JAX reference -----------------------------
def reference_forward(x_bti, raw):
    B, T, _ = x_bti.shape
    x = x_bti.astype(jnp.float32)
    for lay in raw["lstm"]:
        H = lay["w_hh"].shape[1]
        w_ih_t, w_hh_t = lay["w_ih"].T, lay["w_hh"].T
        bias = (lay["b_ih"] + lay["b_hh"])[None, :]
        h = jnp.zeros((B, H), jnp.float32)
        c = jnp.zeros((B, H), jnp.float32)
        outs = []
        for t in range(T):
            gates = x[:, t, :] @ w_ih_t + h @ w_hh_t + bias
            i = jax.nn.sigmoid(gates[:, :H])
            f = jax.nn.sigmoid(gates[:, H:2 * H])
            g = jnp.tanh(gates[:, 2 * H:3 * H])
            o = jax.nn.sigmoid(gates[:, 3 * H:])
            c = f * c + i * g
            h = o * jnp.tanh(c)
            outs.append(h)
        x = jnp.stack(outs, axis=1)
    y = jnp.maximum(x[:, -1, :], 0.0)
    y = y @ raw["w0"].T + raw["b0"]
    y = y @ raw["w1"].T + raw["b1"]
    y = y @ raw["w2"].T + raw["b2"]
    return y


if __name__ == "__main__":
    # Small shapes consistent with the module
    B, T, NUM_SENSORS = 2, 8, 4          # batch, sequence length, input features
    HIDDEN, NUM_LAYERS = 32, 2           # num_hidden_units, num_layers
    LIN_LAYERS, T_OUT = 16, 4            # lin_layers, t (forecast horizon)

    key = jax.random.PRNGKey(0)
    key, kx = jax.random.split(key)
    x = jax.random.normal(kx, (B, T, NUM_SENSORS), jnp.float32)   # batch_first

    raw = init_raw_params(key, NUM_SENSORS, HIDDEN, NUM_LAYERS, LIN_LAYERS, T_OUT)
    kparams = pack_params(raw, NUM_SENSORS, HIDDEN, LIN_LAYERS, T_OUT)

    forward = jax.jit(regression_lstm_forward)
    out = jax.block_until_ready(forward(x, kparams))

    ref = reference_forward(x, raw)
    assert out.shape == (B, T_OUT)
    # Weights are bf16 in the kernel (f32 accumulation), so compare against the
    # f32 reference with a tolerance that covers bf16 rounding.
    assert jnp.allclose(out, ref, atol=5e-2, rtol=5e-2), (
        f"mismatch vs. reference, max abs diff = {jnp.max(jnp.abs(out - ref))}")

    print("KERNEL_OK")
</pallas_src>

<mosaic_0001>
module attributes {stable_mosaic.version = 11 : i64} {
  func.func @_fused_lstm_head_kernel(%arg0: i32, %arg1: memref<64x32xf32, #tpu.memory_space<vmem>>, %arg2: memref<2x32x128xbf16, #tpu.memory_space<vmem>>, %arg3: memref<2x32x128xbf16, #tpu.memory_space<vmem>>, %arg4: memref<2x1x128xf32, #tpu.memory_space<vmem>>, %arg5: memref<32x16xbf16, #tpu.memory_space<vmem>>, %arg6: memref<1x16xf32, #tpu.memory_space<vmem>>, %arg7: memref<16x16xbf16, #tpu.memory_space<vmem>>, %arg8: memref<1x16xf32, #tpu.memory_space<vmem>>, %arg9: memref<16x4xbf16, #tpu.memory_space<vmem>>, %arg10: memref<1x4xf32, #tpu.memory_space<vmem>>, %arg11: memref<2x4xf32, #tpu.memory_space<vmem>>, %arg12: memref<64x32xf32, #tpu.memory_space<vmem>>, %arg13: memref<64x128xf32, #tpu.memory_space<vmem>>) attributes {dimension_semantics = [#tpu.dimension_semantics<arbitrary>], iteration_bounds = array<i64: 1>, scalar_prefetch = 0 : i64, scratch_operands = 2 : i64, tpu.core_type = #tpu.core_type<tc>, window_params = [{pipeline_mode = #tpu.pipeline_mode<synchronous>, transform_indices = @transform_0, window_bounds = array<i64: 64, 32>}, {pipeline_mode = #tpu.pipeline_mode<synchronous>, transform_indices = @transform_1, window_bounds = array<i64: 2, 32, 128>}, {pipeline_mode = #tpu.pipeline_mode<synchronous>, transform_indices = @transform_2, window_bounds = array<i64: 2, 32, 128>}, {pipeline_mode = #tpu.pipeline_mode<synchronous>, transform_indices = @transform_3, window_bounds = array<i64: 2, 1, 128>}, {pipeline_mode = #tpu.pipeline_mode<synchronous>, transform_indices = @transform_4, window_bounds = array<i64: 32, 16>}, {pipeline_mode = #tpu.pipeline_mode<synchronous>, transform_indices = @transform_5, window_bounds = array<i64: 1, 16>}, {pipeline_mode = #tpu.pipeline_mode<synchronous>, transform_indices = @transform_6, window_bounds = array<i64: 16, 16>}, {pipeline_mode = #tpu.pipeline_mode<synchronous>, transform_indices = @transform_7, window_bounds = array<i64: 1, 16>}, {pipeline_mode = #tpu.pipeline_mode<synchronous>, transform_indices = @transform_8, window_bounds = array<i64: 16, 4>}, {pipeline_mode = #tpu.pipeline_mode<synchronous>, transform_indices = @transform_9, window_bounds = array<i64: 1, 4>}, {pipeline_mode = #tpu.pipeline_mode<synchronous>, transform_indices = @transform_10, window_bounds = array<i64: 2, 4>}]} {
    %0 = tpu.iota {dimensions = array<i32: 1>} : vector<8x128xi32>
    %c64_i32 = arith.constant 64 : i32
    %1 = vector.broadcast %c64_i32 : i32 to vector<8x128xi32>
    %2 = arith.cmpi sge, %0, %1 : vector<8x128xi32>
    %c96_i32 = arith.constant 96 : i32
    %3 = vector.broadcast %c96_i32 : i32 to vector<8x128xi32>
    %4 = arith.cmpi slt, %0, %3 : vector<8x128xi32>
    %5 = arith.andi %2, %4 : vector<8x128xi1>
    %c0 = arith.constant 0 : index
    %c0_0 = arith.constant 0 : index
    %6 = vector.load %arg1[%c0, %c0_0] : memref<64x32xf32, #tpu.memory_space<vmem>>, vector<64x32xf32>
    %7 = arith.truncf %6 : vector<64x32xf32> to vector<64x32xbf16>
    %c0_1 = arith.constant 0 : index
    %c0_2 = arith.constant 0 : index
    %c0_3 = arith.constant 0 : index
    %8 = vector.load %arg2[%c0_1, %c0_2, %c0_3] : memref<2x32x128xbf16, #tpu.memory_space<vmem>>, vector<1x32x128xbf16>
    %9 = vector.shape_cast %8 : vector<1x32x128xbf16> to vector<32x128xbf16>
    %cst = arith.constant dense<0.000000e+00> : vector<64x128xf32>
    %10 = tpu.matmul %7, %9, %cst {dimension_numbers = #tpu.dot_dimension_numbers<[1], [0], [0], [1], [0, 0, 1, 1], [], []>} : vector<64x32xbf16>, vector<32x128xbf16>, vector<64x128xf32> -> vector<64x128xf32>
    %c0_4 = arith.constant 0 : index
    %c0_5 = arith.constant 0 : index
    %c0_6 = arith.constant 0 : index
    %11 = vector.load %arg4[%c0_4, %c0_5, %c0_6] : memref<2x1x128xf32, #tpu.memory_space<vmem>>, vector<1x1x128xf32>
    %12 = vector.shape_cast %11 : vector<1x1x128xf32> to vector<1x128xf32>
    %13 = vector.broadcast %12 : vector<1x128xf32> to vector<64x128xf32>
    %14 = arith.addf %10, %13 : vector<64x128xf32>
    %c0_7 = arith.constant 0 : index
    %c0_8 = arith.constant 0 : index
    %15 = vector.load %arg13[%c0_7, %c0_8] : memref<64x128xf32, #tpu.memory_space<vmem>>, vector<64x128xf32>
    tpu.vector_store %arg13[%c0_7, %c0_8], %14 {strides = array<i32>} : memref<64x128xf32, #tpu.memory_space<vmem>>, vector<64x128xf32>,
    %c0_9 = arith.constant 0 : index
    %c0_10 = arith.constant 0 : index
    %c0_11 = arith.constant 0 : index
    %16 = vector.load %arg3[%c0_9, %c0_10, %c0_11] : memref<2x32x128xbf16, #tpu.memory_space<vmem>>, vector<1x32x128xbf16>
    %17 = vector.shape_cast %16 : vector<1x32x128xbf16> to vector<32x128xbf16>
    %cst_12 = arith.constant 0.000000e+00 : f32
    %18 = vector.broadcast %cst_12 : f32 to vector<8x32xf32>
    %cst_13 = arith.constant 0.000000e+00 : f32
    %19 = vector.broadcast %cst_13 : f32 to vector<8x32xf32>
    %c0_i32 = arith.constant 0 : i32
    %c8_i32 = arith.constant 8 : i32
    %20 = arith.muli %c0_i32, %c8_i32 : i32
    %21 = tpu.assume_multiple %20, 8 : i32
    %22 = arith.index_cast %21 : i32 to index
    %c0_14 = arith.constant 0 : index
    %23 = vector.load %arg13[%22, %c0_14] : memref<64x128xf32, #tpu.memory_space<vmem>>, vector<8x128xf32>
    %24 = arith.truncf %18 : vector<8x32xf32> to vector<8x32xbf16>
    %cst_15 = arith.constant dense<0.000000e+00> : vector<8x128xf32>
    %25 = tpu.matmul %24, %17, %cst_15 {dimension_numbers = #tpu.dot_dimension_numbers<[1], [0], [0], [1], [0, 0, 1, 1], [], []>} : vector<8x32xbf16>, vector<32x128xbf16>, vector<8x128xf32> -> vector<8x128xf32>
    %26 = arith.addf %23, %25 : vector<8x128xf32>
    %cst_16 = arith.constant 2.000000e+00 : f32
    %27 = vector.broadcast %cst_16 : f32 to vector<8x128xf32>
    %28 = arith.mulf %27, %26 : vector<8x128xf32>
    %29 = arith.select %5, %28, %26 : vector<8x128xi1>, vector<8x128xf32>
    %30 = arith.negf %29 : vector<8x128xf32>
    %31 = math.exp %30 : vector<8x128xf32>
    %cst_17 = arith.constant 1.000000e+00 : f32
    %32 = vector.broadcast %cst_17 : f32 to vector<8x128xf32>
    %33 = arith.addf %32, %31 : vector<8x128xf32>
    %34 = arith.divf %32, %33 : vector<8x128xf32>
    %cst_18 = arith.constant 2.000000e+00 : f32
    %35 = vector.broadcast %cst_18 : f32 to vector<8x128xf32>
    %36 = arith.mulf %35, %34 : vector<8x128xf32>
    %cst_19 = arith.constant 1.000000e+00 : f32
    %37 = vector.broadcast %cst_19 : f32 to vector<8x128xf32>
    %38 = arith.subf %36, %37 : vector<8x128xf32>
    %39 = arith.select %5, %38, %34 : vector<8x128xi1>, vector<8x128xf32>
    %40 = vector.extract_strided_slice %39 {offsets = [0, 0], sizes = [8, 32], strides = [1, 1]} : vector<8x128xf32> to vector<8x32xf32>
    %41 = vector.extract_strided_slice %39 {offsets = [0, 32], sizes = [8, 32], strides = [1, 1]} : vector<8x128xf32> to vector<8x32xf32>
    %42 = vector.extract_strided_slice %39 {offsets = [0, 64], sizes = [8, 32], strides = [1, 1]} : vector<8x128xf32> to vector<8x32xf32>
    %43 = vector.extract_strided_slice %39 {offsets = [0, 96], sizes = [8, 32], strides = [1, 1]} : vector<8x128xf32> to vector<8x32xf32>
    %44 = arith.mulf %41, %19 : vector<8x32xf32>
    %45 = arith.mulf %40, %42 : vector<8x32xf32>
    %46 = arith.addf %44, %45 : vector<8x32xf32>
    %47 = math.tanh %46 : vector<8x32xf32>
    %48 = arith.mulf %43, %47 : vector<8x32xf32>
    %49 = arith.index_cast %21 : i32 to index
    %c0_20 = arith.constant 0 : index
    %50 = vector.load %arg12[%49, %c0_20] : memref<64x32xf32, #tpu.memory_space<vmem>>, vector<8x32xf32>
    tpu.vector_store %arg12[%49, %c0_20], %48 {strides = array<i32>} : memref<64x32xf32, #tpu.memory_space<vmem>>, vector<8x32xf32>,
    %c1_i32 = arith.constant 1 : i32
    %c8_i32_21 = arith.constant 8 : i32
    %51 = arith.muli %c1_i32, %c8_i32_21 : i32
    %52 = tpu.assume_multiple %51, 8 : i32
    %53 = arith.index_cast %52 : i32 to index
    %c0_22 = arith.constant 0 : index
    %54 = vector.load %arg13[%53, %c0_22] : memref<64x128xf32, #tpu.memory_space<vmem>>, vector<8x128xf32>
    %55 = arith.truncf %48 : vector<8x32xf32> to vector<8x32xbf16>
    %cst_23 = arith.constant dense<0.000000e+00> : vector<8x128xf32>
    %56 = tpu.matmul %55, %17, %cst_23 {dimension_numbers = #tpu.dot_dimension_numbers<[1], [0], [0], [1], [0, 0, 1, 1], [], []>} : vector<8x32xbf16>, vector<32x128xbf16>, vector<8x128xf32> -> vector<8x128xf32>
    %57 = arith.addf %54, %56 : vector<8x128xf32>
    %cst_24 = arith.constant 2.000000e+00 : f32
    %58 = vector.broadcast %cst_24 : f32 to vector<8x128xf32>
    %59 = arith.mulf %58, %57 : vector<8x128xf32>
    %60 = arith.select %5, %59, %57 : vector<8x128xi1>, vector<8x128xf32>
    %61 = arith.negf %60 : vector<8x128xf32>
    %62 = math.exp %61 : vector<8x128xf32>
    %cst_25 = arith.constant 1.000000e+00 : f32
    %63 = vector.broadcast %cst_25 : f32 to vector<8x128xf32>
    %64 = arith.addf %63, %62 : vector<8x128xf32>
    %65 = arith.divf %63, %64 : vector<8x128xf32>
    %cst_26 = arith.constant 2.000000e+00 : f32
    %66 = vector.broadcast %cst_26 : f32 to vector<8x128xf32>
    %67 = arith.mulf %66, %65 : vector<8x128xf32>
    %cst_27 = arith.constant 1.000000e+00 : f32
    %68 = vector.broadcast %cst_27 : f32 to vector<8x128xf32>
    %69 = arith.subf %67, %68 : vector<8x128xf32>
    %70 = arith.select %5, %69, %65 : vector<8x128xi1>, vector<8x128xf32>
    %71 = vector.extract_strided_slice %70 {offsets = [0, 0], sizes = [8, 32], strides = [1, 1]} : vector<8x128xf32> to vector<8x32xf32>
    %72 = vector.extract_strided_slice %70 {offsets = [0, 32], sizes = [8, 32], strides = [1, 1]} : vector<8x128xf32> to vector<8x32xf32>
    %73 = vector.extract_strided_slice %70 {offsets = [0, 64], sizes = [8, 32], strides = [1, 1]} : vector<8x128xf32> to vector<8x32xf32>
    %74 = vector.extract_strided_slice %70 {offsets = [0, 96], sizes = [8, 32], strides = [1, 1]} : vector<8x128xf32> to vector<8x32xf32>
    %75 = arith.mulf %72, %46 : vector<8x32xf32>
    %76 = arith.mulf %71, %73 : vector<8x32xf32>
    %77 = arith.addf %75, %76 : vector<8x32xf32>
    %78 = math.tanh %77 : vector<8x32xf32>
    %79 = arith.mulf %74, %78 : vector<8x32xf32>
    %80 = arith.index_cast %52 : i32 to index
    %c0_28 = arith.constant 0 : index
    %81 = vector.load %arg12[%80, %c0_28] : memref<64x32xf32, #tpu.memory_space<vmem>>, vector<8x32xf32>
    tpu.vector_store %arg12[%80, %c0_28], %79 {strides = array<i32>} : memref<64x32xf32, #tpu.memory_space<vmem>>, vector<8x32xf32>,
    %c2_i32 = arith.constant 2 : i32
    %c8_i32_29 = arith.constant 8 : i32
    %82 = arith.muli %c2_i32, %c8_i32_29 : i32
    %83 = tpu.assume_multiple %82, 8 : i32
    %84 = arith.index_cast %83 : i32 to index
    %c0_30 = arith.constant 0 : index
    %85 = vector.load %arg13[%84, %c0_30] : memref<64x128xf32, #tpu.memory_space<vmem>>, vector<8x128xf32>
    %86 = arith.truncf %79 : vector<8x32xf32> to vector<8x32xbf16>
    %cst_31 = arith.constant dense<0.000000e+00> : vector<8x128xf32>
    %87 = tpu.matmul %86, %17, %cst_31 {dimension_numbers = #tpu.dot_dimension_numbers<[1], [0], [0], [1], [0, 0, 1, 1], [], []>} : vector<8x32xbf16>, vector<32x128xbf16>, vector<8x128xf32> -> vector<8x128xf32>
    %88 = arith.addf %85, %87 : vector<8x128xf32>
    %cst_32 = arith.constant 2.000000e+00 : f32
    %89 = vector.broadcast %cst_32 : f32 to vector<8x128xf32>
    %90 = arith.mulf %89, %88 : vector<8x128xf32>
    %91 = arith.select %5, %90, %88 : vector<8x128xi1>, vector<8x128xf32>
    %92 = arith.negf %91 : vector<8x128xf32>
    %93 = math.exp %92 : vector<8x128xf32>
    %cst_33 = arith.constant 1.000000e+00 : f32
    %94 = vector.broadcast %cst_33 : f32 to vector<8x128xf32>
    %95 = arith.addf %94, %93 : vector<8x128xf32>
    %96 = arith.divf %94, %95 : vector<8x128xf32>
    %cst_34 = arith.constant 2.000000e+00 : f32
    %97 = vector.broadcast %cst_34 : f32 to vector<8x128xf32>
    %98 = arith.mulf %97, %96 : vector<8x128xf32>
    %cst_35 = arith.constant 1.000000e+00 : f32
    %99 = vector.broadcast %cst_35 : f32 to vector<8x128xf32>
    %100 = arith.subf %98, %99 : vector<8x128xf32>
    %101 = arith.select %5, %100, %96 : vector<8x128xi1>, vector<8x128xf32>
    %102 = vector.extract_strided_slice %101 {offsets = [0, 0], sizes = [8, 32], strides = [1, 1]} : vector<8x128xf32> to vector<8x32xf32>
    %103 = vector.extract_strided_slice %101 {offsets = [0, 32], sizes = [8, 32], strides = [1, 1]} : vector<8x128xf32> to vector<8x32xf32>
    %104 = vector.extract_strided_slice %101 {offsets = [0, 64], sizes = [8, 32], strides = [1, 1]} : vector<8x128xf32> to vector<8x32xf32>
    %105 = vector.extract_strided_slice %101 {offsets = [0, 96], sizes = [8, 32], strides = [1, 1]} : vector<8x128xf32> to vector<8x32xf32>
    %106 = arith.mulf %103, %77 : vector<8x32xf32>
    %107 = arith.mulf %102, %104 : vector<8x32xf32>
    %108 = arith.addf %106, %107 : vector<8x32xf32>
    %109 = math.tanh %108 : vector<8x32xf32>
    %110 = arith.mulf %105, %109 : vector<8x32xf32>
    %111 = arith.index_cast %83 : i32 to index
    %c0_36 = arith.constant 0 : index
    %112 = vector.load %arg12[%111, %c0_36] : memref<64x32xf32, #tpu.memory_space<vmem>>, vector<8x32xf32>
    tpu.vector_store %arg12[%111, %c0_36], %110 {strides = array<i32>} : memref<64x32xf32, #tpu.memory_space<vmem>>, vector<8x32xf32>,
    %c3_i32 = arith.constant 3 : i32
    %c8_i32_37 = arith.constant 8 : i32
    %113 = arith.muli %c3_i32, %c8_i32_37 : i32
    %114 = tpu.assume_multiple %113, 8 : i32
    %115 = arith.index_cast %114 : i32 to index
    %c0_38 = arith.constant 0 : index
    %116 = vector.load %arg13[%115, %c0_38] : memref<64x128xf32, #tpu.memory_space<vmem>>, vector<8x128xf32>
    %117 = arith.truncf %110 : vector<8x32xf32> to vector<8x32xbf16>
    %cst_39 = arith.constant dense<0.000000e+00> : vector<8x128xf32>
    %118 = tpu.matmul %117, %17, %cst_39 {dimension_numbers = #tpu.dot_dimension_numbers<[1], [0], [0], [1], [0, 0, 1, 1], [], []>} : vector<8x32xbf16>, vector<32x128xbf16>, vector<8x128xf32> -> vector<8x128xf32>
    %119 = arith.addf %116, %118 : vector<8x128xf32>
    %cst_40 = arith.constant 2.000000e+00 : f32
    %120 = vector.broadcast %cst_40 : f32 to vector<8x128xf32>
    %121 = arith.mulf %120, %119 : vector<8x128xf32>
    %122 = arith.select %5, %121, %119 : vector<8x128xi1>, vector<8x128xf32>
    %123 = arith.negf %122 : vector<8x128xf32>
    %124 = math.exp %123 : vector<8x128xf32>
    %cst_41 = arith.constant 1.000000e+00 : f32
    %125 = vector.broadcast %cst_41 : f32 to vector<8x128xf32>
    %126 = arith.addf %125, %124 : vector<8x128xf32>
    %127 = arith.divf %125, %126 : vector<8x128xf32>
    %cst_42 = arith.constant 2.000000e+00 : f32
    %128 = vector.broadcast %cst_42 : f32 to vector<8x128xf32>
    %129 = arith.mulf %128, %127 : vector<8x128xf32>
    %cst_43 = arith.constant 1.000000e+00 : f32
    %130 = vector.broadcast %cst_43 : f32 to vector<8x128xf32>
    %131 = arith.subf %129, %130 : vector<8x128xf32>
    %132 = arith.select %5, %131, %127 : vector<8x128xi1>, vector<8x128xf32>
    %133 = vector.extract_strided_slice %132 {offsets = [0, 0], sizes = [8, 32], strides = [1, 1]} : vector<8x128xf32> to vector<8x32xf32>
    %134 = vector.extract_strided_slice %132 {offsets = [0, 32], sizes = [8, 32], strides = [1, 1]} : vector<8x128xf32> to vector<8x32xf32>
    %135 = vector.extract_strided_slice %132 {offsets = [0, 64], sizes = [8, 32], strides = [1, 1]} : vector<8x128xf32> to vector<8x32xf32>
    %136 = vector.extract_strided_slice %132 {offsets = [0, 96], sizes = [8, 32], strides = [1, 1]} : vector<8x128xf32> to vector<8x32xf32>
    %137 = arith.mulf %134, %108 : vector<8x32xf32>
    %138 = arith.mulf %133, %135 : vector<8x32xf32>
    %139 = arith.addf %137, %138 : vector<8x32xf32>
    %140 = math.tanh %139 : vector<8x32xf32>
    %141 = arith.mulf %136, %140 : vector<8x32xf32>
    %142 = arith.index_cast %114 : i32 to index
    %c0_44 = arith.constant 0 : index
    %143 = vector.load %arg12[%142, %c0_44] : memref<64x32xf32, #tpu.memory_space<vmem>>, vector<8x32xf32>
    tpu.vector_store %arg12[%142, %c0_44], %141 {strides = array<i32>} : memref<64x32xf32, #tpu.memory_space<vmem>>, vector<8x32xf32>,
    %c4_i32 = arith.constant 4 : i32
    %c8_i32_45 = arith.constant 8 : i32
    %144 = arith.muli %c4_i32, %c8_i32_45 : i32
    %145 = tpu.assume_multiple %144, 8 : i32
    %146 = arith.index_cast %145 : i32 to index
    %c0_46 = arith.constant 0 : index
    %147 = vector.load %arg13[%146, %c0_46] : memref<64x128xf32, #tpu.memory_space<vmem>>, vector<8x128xf32>
    %148 = arith.truncf %141 : vector<8x32xf32> to vector<8x32xbf16>
    %cst_47 = arith.constant dense<0.000000e+00> : vector<8x128xf32>
    %149 = tpu.matmul %148, %17, %cst_47 {dimension_numbers = #tpu.dot_dimension_numbers<[1], [0], [0], [1], [0, 0, 1, 1], [], []>} : vector<8x32xbf16>, vector<32x128xbf16>, vector<8x128xf32> -> vector<8x128xf32>
    %150 = arith.addf %147, %149 : vector<8x128xf32>
    %cst_48 = arith.constant 2.000000e+00 : f32
    %151 = vector.broadcast %cst_48 : f32 to vector<8x128xf32>
    %152 = arith.mulf %151, %150 : vector<8x128xf32>
    %153 = arith.select %5, %152, %150 : vector<8x128xi1>, vector<8x128xf32>
    %154 = arith.negf %153 : vector<8x128xf32>
    %155 = math.exp %154 : vector<8x128xf32>
    %cst_49 = arith.constant 1.000000e+00 : f32
    %156 = vector.broadcast %cst_49 : f32 to vector<8x128xf32>
    %157 = arith.addf %156, %155 : vector<8x128xf32>
    %158 = arith.divf %156, %157 : vector<8x128xf32>
    %cst_50 = arith.constant 2.000000e+00 : f32
    %159 = vector.broadcast %cst_50 : f32 to vector<8x128xf32>
    %160 = arith.mulf %159, %158 : vector<8x128xf32>
    %cst_51 = arith.constant 1.000000e+00 : f32
    %161 = vector.broadcast %cst_51 : f32 to vector<8x128xf32>
    %162 = arith.subf %160, %161 : vector<8x128xf32>
    %163 = arith.select %5, %162, %158 : vector<8x128xi1>, vector<8x128xf32>
    %164 = vector.extract_strided_slice %163 {offsets = [0, 0], sizes = [8, 32], strides = [1, 1]} : vector<8x128xf32> to vector<8x32xf32>
    %165 = vector.extract_strided_slice %163 {offsets = [0, 32], sizes = [8, 32], strides = [1, 1]} : vector<8x128xf32> to vector<8x32xf32>
    %166 = vector.extract_strided_slice %163 {offsets = [0, 64], sizes = [8, 32], strides = [1, 1]} : vector<8x128xf32> to vector<8x32xf32>
    %167 = vector.extract_strided_slice %163 {offsets = [0, 96], sizes = [8, 32], strides = [1, 1]} : vector<8x128xf32> to vector<8x32xf32>
    %168 = arith.mulf %165, %139 : vector<8x32xf32>
    %169 = arith.mulf %164, %166 : vector<8x32xf32>
    %170 = arith.addf %168, %169 : vector<8x32xf32>
    %171 = math.tanh %170 : vector<8x32xf32>
    %172 = arith.mulf %167, %171 : vector<8x32xf32>
    %173 = arith.index_cast %145 : i32 to index
    %c0_52 = arith.constant 0 : index
    %174 = vector.load %arg12[%173, %c0_52] : memref<64x32xf32, #tpu.memory_space<vmem>>, vector<8x32xf32>
    tpu.vector_store %arg12[%173, %c0_52], %172 {strides = array<i32>} : memref<64x32xf32, #tpu.memory_space<vmem>>, vector<8x32xf32>,
    %c5_i32 = arith.constant 5 : i32
    %c8_i32_53 = arith.constant 8 : i32
    %175 = arith.muli %c5_i32, %c8_i32_53 : i32
    %176 = tpu.assume_multiple %175, 8 : i32
    %177 = arith.index_cast %176 : i32 to index
    %c0_54 = arith.constant 0 : index
    %178 = vector.load %arg13[%177, %c0_54] : memref<64x128xf32, #tpu.memory_space<vmem>>, vector<8x128xf32>
    %179 = arith.truncf %172 : vector<8x32xf32> to vector<8x32xbf16>
    %cst_55 = arith.constant dense<0.000000e+00> : vector<8x128xf32>
    %180 = tpu.matmul %179, %17, %cst_55 {dimension_numbers = #tpu.dot_dimension_numbers<[1], [0], [0], [1], [0, 0, 1, 1], [], []>} : vector<8x32xbf16>, vector<32x128xbf16>, vector<8x128xf32> -> vector<8x128xf32>
    %181 = arith.addf %178, %180 : vector<8x128xf32>
    %cst_56 = arith.constant 2.000000e+00 : f32
    %182 = vector.broadcast %cst_56 : f32 to vector<8x128xf32>
    %183 = arith.mulf %182, %181 : vector<8x128xf32>
    %184 = arith.select %5, %183, %181 : vector<8x128xi1>, vector<8x128xf32>
    %185 = arith.negf %184 : vector<8x128xf32>
    %186 = math.exp %185 : vector<8x128xf32>
    %cst_57 = arith.constant 1.000000e+00 : f32
    %187 = vector.broadcast %cst_57 : f32 to vector<8x128xf32>
    %188 = arith.addf %187, %186 : vector<8x128xf32>
    %189 = arith.divf %187, %188 : vector<8x128xf32>
    %cst_58 = arith.constant 2.000000e+00 : f32
    %190 = vector.broadcast %cst_58 : f32 to vector<8x128xf32>
    %191 = arith.mulf %190, %189 : vector<8x128xf32>
    %cst_59 = arith.constant 1.000000e+00 : f32
    %192 = vector.broadcast %cst_59 : f32 to vector<8x128xf32>
    %193 = arith.subf %191, %192 : vector<8x128xf32>
    %194 = arith.select %5, %193, %189 : vector<8x128xi1>, vector<8x128xf32>
    %195 = vector.extract_strided_slice %194 {offsets = [0, 0], sizes = [8, 32], strides = [1, 1]} : vector<8x128xf32> to vector<8x32xf32>
    %196 = vector.extract_strided_slice %194 {offsets = [0, 32], sizes = [8, 32], strides = [1, 1]} : vector<8x128xf32> to vector<8x32xf32>
    %197 = vector.extract_strided_slice %194 {offsets = [0, 64], sizes = [8, 32], strides = [1, 1]} : vector<8x128xf32> to vector<8x32xf32>
    %198 = vector.extract_strided_slice %194 {offsets = [0, 96], sizes = [8, 32], strides = [1, 1]} : vector<8x128xf32> to vector<8x32xf32>
    %199 = arith.mulf %196, %170 : vector<8x32xf32>
    %200 = arith.mulf %195, %197 : vector<8x32xf32>
    %201 = arith.addf %199, %200 : vector<8x32xf32>
    %202 = math.tanh %201 : vector<8x32xf32>
    %203 = arith.mulf %198, %202 : vector<8x32xf32>
    %204 = arith.index_cast %176 : i32 to index
    %c0_60 = arith.constant 0 : index
    %205 = vector.load %arg12[%204, %c0_60] : memref<64x32xf32, #tpu.memory_space<vmem>>, vector<8x32xf32>
    tpu.vector_store %arg12[%204, %c0_60], %203 {strides = array<i32>} : memref<64x32xf32, #tpu.memory_space<vmem>>, vector<8x32xf32>,
    %c6_i32 = arith.constant 6 : i32
    %c8_i32_61 = arith.constant 8 : i32
    %206 = arith.muli %c6_i32, %c8_i32_61 : i32
    %207 = tpu.assume_multiple %206, 8 : i32
    %208 = arith.index_cast %207 : i32 to index
    %c0_62 = arith.constant 0 : index
    %209 = vector.load %arg13[%208, %c0_62] : memref<64x128xf32, #tpu.memory_space<vmem>>, vector<8x128xf32>
    %210 = arith.truncf %203 : vector<8x32xf32> to vector<8x32xbf16>
    %cst_63 = arith.constant dense<0.000000e+00> : vector<8x128xf32>
    %211 = tpu.matmul %210, %17, %cst_63 {dimension_numbers = #tpu.dot_dimension_numbers<[1], [0], [0], [1], [0, 0, 1, 1], [], []>} : vector<8x32xbf16>, vector<32x128xbf16>, vector<8x128xf32> -> vector<8x128xf32>
    %212 = arith.addf %209, %211 : vector<8x128xf32>
    %cst_64 = arith.constant 2.000000e+00 : f32
    %213 = vector.broadcast %cst_64 : f32 to vector<8x128xf32>
    %214 = arith.mulf %213, %212 : vector<8x128xf32>
    %215 = arith.select %5, %214, %212 : vector<8x128xi1>, vector<8x128xf32>
    %216 = arith.negf %215 : vector<8x128xf32>
    %217 = math.exp %216 : vector<8x128xf32>
    %cst_65 = arith.constant 1.000000e+00 : f32
    %218 = vector.broadcast %cst_65 : f32 to vector<8x128xf32>
    %219 = arith.addf %218, %217 : vector<8x128xf32>
    %220 = arith.divf %218, %219 : vector<8x128xf32>
    %cst_66 = arith.constant 2.000000e+00 : f32
    %221 = vector.broadcast %cst_66 : f32 to vector<8x128xf32>
    %222 = arith.mulf %221, %220 : vector<8x128xf32>
    %cst_67 = arith.constant 1.000000e+00 : f32
    %223 = vector.broadcast %cst_67 : f32 to vector<8x128xf32>
    %224 = arith.subf %222, %223 : vector<8x128xf32>
    %225 = arith.select %5, %224, %220 : vector<8x128xi1>, vector<8x128xf32>
    %226 = vector.extract_strided_slice %225 {offsets = [0, 0], sizes = [8, 32], strides = [1, 1]} : vector<8x128xf32> to vector<8x32xf32>
    %227 = vector.extract_strided_slice %225 {offsets = [0, 32], sizes = [8, 32], strides = [1, 1]} : vector<8x128xf32> to vector<8x32xf32>
    %228 = vector.extract_strided_slice %225 {offsets = [0, 64], sizes = [8, 32], strides = [1, 1]} : vector<8x128xf32> to vector<8x32xf32>
    %229 = vector.extract_strided_slice %225 {offsets = [0, 96], sizes = [8, 32], strides = [1, 1]} : vector<8x128xf32> to vector<8x32xf32>
    %230 = arith.mulf %227, %201 : vector<8x32xf32>
    %231 = arith.mulf %226, %228 : vector<8x32xf32>
    %232 = arith.addf %230, %231 : vector<8x32xf32>
    %233 = math.tanh %232 : vector<8x32xf32>
    %234 = arith.mulf %229, %233 : vector<8x32xf32>
    %235 = arith.index_cast %207 : i32 to index
    %c0_68 = arith.constant 0 : index
    %236 = vector.load %arg12[%235, %c0_68] : memref<64x32xf32, #tpu.memory_space<vmem>>, vector<8x32xf32>
    tpu.vector_store %arg12[%235, %c0_68], %234 {strides = array<i32>} : memref<64x32xf32, #tpu.memory_space<vmem>>, vector<8x32xf32>,
    %c7_i32 = arith.constant 7 : i32
    %c8_i32_69 = arith.constant 8 : i32
    %237 = arith.muli %c7_i32, %c8_i32_69 : i32
    %238 = tpu.assume_multiple %237, 8 : i32
    %239 = arith.index_cast %238 : i32 to index
    %c0_70 = arith.constant 0 : index
    %240 = vector.load %arg13[%239, %c0_70] : memref<64x128xf32, #tpu.memory_space<vmem>>, vector<8x128xf32>
    %241 = arith.truncf %234 : vector<8x32xf32> to vector<8x32xbf16>
    %cst_71 = arith.constant dense<0.000000e+00> : vector<8x128xf32>
    %242 = tpu.matmul %241, %17, %cst_71 {dimension_numbers = #tpu.dot_dimension_numbers<[1], [0], [0], [1], [0, 0, 1, 1], [], []>} : vector<8x32xbf16>, vector<32x128xbf16>, vector<8x128xf32> -> vector<8x128xf32>
    %243 = arith.addf %240, %242 : vector<8x128xf32>
    %cst_72 = arith.constant 2.000000e+00 : f32
    %244 = vector.broadcast %cst_72 : f32 to vector<8x128xf32>
    %245 = arith.mulf %244, %243 : vector<8x128xf32>
    %246 = arith.select %5, %245, %243 : vector<8x128xi1>, vector<8x128xf32>
    %247 = arith.negf %246 : vector<8x128xf32>
    %248 = math.exp %247 : vector<8x128xf32>
    %cst_73 = arith.constant 1.000000e+00 : f32
    %249 = vector.broadcast %cst_73 : f32 to vector<8x128xf32>
    %250 = arith.addf %249, %248 : vector<8x128xf32>
    %251 = arith.divf %249, %250 : vector<8x128xf32>
    %cst_74 = arith.constant 2.000000e+00 : f32
    %252 = vector.broadcast %cst_74 : f32 to vector<8x128xf32>
    %253 = arith.mulf %252, %251 : vector<8x128xf32>
    %cst_75 = arith.constant 1.000000e+00 : f32
    %254 = vector.broadcast %cst_75 : f32 to vector<8x128xf32>
    %255 = arith.subf %253, %254 : vector<8x128xf32>
    %256 = arith.select %5, %255, %251 : vector<8x128xi1>, vector<8x128xf32>
    %257 = vector.extract_strided_slice %256 {offsets = [0, 0], sizes = [8, 32], strides = [1, 1]} : vector<8x128xf32> to vector<8x32xf32>
    %258 = vector.extract_strided_slice %256 {offsets = [0, 32], sizes = [8, 32], strides = [1, 1]} : vector<8x128xf32> to vector<8x32xf32>
    %259 = vector.extract_strided_slice %256 {offsets = [0, 64], sizes = [8, 32], strides = [1, 1]} : vector<8x128xf32> to vector<8x32xf32>
    %260 = vector.extract_strided_slice %256 {offsets = [0, 96], sizes = [8, 32], strides = [1, 1]} : vector<8x128xf32> to vector<8x32xf32>
    %261 = arith.mulf %258, %232 : vector<8x32xf32>
    %262 = arith.mulf %257, %259 : vector<8x32xf32>
    %263 = arith.addf %261, %262 : vector<8x32xf32>
    %264 = math.tanh %263 : vector<8x32xf32>
    %265 = arith.mulf %260, %264 : vector<8x32xf32>
    %266 = arith.index_cast %238 : i32 to index
    %c0_76 = arith.constant 0 : index
    %267 = vector.load %arg12[%266, %c0_76] : memref<64x32xf32, #tpu.memory_space<vmem>>, vector<8x32xf32>
    tpu.vector_store %arg12[%266, %c0_76], %265 {strides = array<i32>} : memref<64x32xf32, #tpu.memory_space<vmem>>, vector<8x32xf32>,
    %c8_i32_77 = arith.constant 8 : i32
    %c0_78 = arith.constant 0 : index
    %c0_79 = arith.constant 0 : index
    %268 = vector.load %arg12[%c0_78, %c0_79] : memref<64x32xf32, #tpu.memory_space<vmem>>, vector<64x32xf32>
    %269 = arith.truncf %268 : vector<64x32xf32> to vector<64x32xbf16>
    %c1 = arith.constant 1 : index
    %c0_80 = arith.constant 0 : index
    %c0_81 = arith.constant 0 : index
    %270 = vector.load %arg2[%c1, %c0_80, %c0_81] : memref<2x32x128xbf16, #tpu.memory_space<vmem>>, vector<1x32x128xbf16>
    %271 = vector.shape_cast %270 : vector<1x32x128xbf16> to vector<32x128xbf16>
    %cst_82 = arith.constant dense<0.000000e+00> : vector<64x128xf32>
    %272 = tpu.matmul %269, %271, %cst_82 {dimension_numbers = #tpu.dot_dimension_numbers<[1], [0], [0], [1], [0, 0, 1, 1], [], []>} : vector<64x32xbf16>, vector<32x128xbf16>, vector<64x128xf32> -> vector<64x128xf32>
    %c1_83 = arith.constant 1 : index
    %c0_84 = arith.constant 0 : index
    %c0_85 = arith.constant 0 : index
    %273 = vector.load %arg4[%c1_83, %c0_84, %c0_85] : memref<2x1x128xf32, #tpu.memory_space<vmem>>, vector<1x1x128xf32>
    %274 = vector.shape_cast %273 : vector<1x1x128xf32> to vector<1x128xf32>
    %275 = vector.broadcast %274 : vector<1x128xf32> to vector<64x128xf32>
    %276 = arith.addf %272, %275 : vector<64x128xf32>
    %c0_86 = arith.constant 0 : index
    %c0_87 = arith.constant 0 : index
    %277 = vector.load %arg13[%c0_86, %c0_87] : memref<64x128xf32, #tpu.memory_space<vmem>>, vector<64x128xf32>
    tpu.vector_store %arg13[%c0_86, %c0_87], %276 {strides = array<i32>} : memref<64x128xf32, #tpu.memory_space<vmem>>, vector<64x128xf32>,
    %c1_88 = arith.constant 1 : index
    %c0_89 = arith.constant 0 : index
    %c0_90 = arith.constant 0 : index
    %278 = vector.load %arg3[%c1_88, %c0_89, %c0_90] : memref<2x32x128xbf16, #tpu.memory_space<vmem>>, vector<1x32x128xbf16>
    %279 = vector.shape_cast %278 : vector<1x32x128xbf16> to vector<32x128xbf16>
    %cst_91 = arith.constant 0.000000e+00 : f32
    %280 = vector.broadcast %cst_91 : f32 to vector<8x32xf32>
    %cst_92 = arith.constant 0.000000e+00 : f32
    %281 = vector.broadcast %cst_92 : f32 to vector<8x32xf32>
    %c0_i32_93 = arith.constant 0 : i32
    %c8_i32_94 = arith.constant 8 : i32
    %282 = arith.muli %c0_i32_93, %c8_i32_94 : i32
    %283 = tpu.assume_multiple %282, 8 : i32
    %284 = arith.index_cast %283 : i32 to index
    %c0_95 = arith.constant 0 : index
    %285 = vector.load %arg13[%284, %c0_95] : memref<64x128xf32, #tpu.memory_space<vmem>>, vector<8x128xf32>
    %286 = arith.truncf %280 : vector<8x32xf32> to vector<8x32xbf16>
    %cst_96 = arith.constant dense<0.000000e+00> : vector<8x128xf32>
    %287 = tpu.matmul %286, %279, %cst_96 {dimension_numbers = #tpu.dot_dimension_numbers<[1], [0], [0], [1], [0, 0, 1, 1], [], []>} : vector<8x32xbf16>, vector<32x128xbf16>, vector<8x128xf32> -> vector<8x128xf32>
    %288 = arith.addf %285, %287 : vector<8x128xf32>
    %cst_97 = arith.constant 2.000000e+00 : f32
    %289 = vector.broadcast %cst_97 : f32 to vector<8x128xf32>
    %290 = arith.mulf %289, %288 : vector<8x128xf32>
    %291 = arith.select %5, %290, %288 : vector<8x128xi1>, vector<8x128xf32>
    %292 = arith.negf %291 : vector<8x128xf32>
    %293 = math.exp %292 : vector<8x128xf32>
    %cst_98 = arith.constant 1.000000e+00 : f32
    %294 = vector.broadcast %cst_98 : f32 to vector<8x128xf32>
    %295 = arith.addf %294, %293 : vector<8x128xf32>
    %296 = arith.divf %294, %295 : vector<8x128xf32>
    %cst_99 = arith.constant 2.000000e+00 : f32
    %297 = vector.broadcast %cst_99 : f32 to vector<8x128xf32>
    %298 = arith.mulf %297, %296 : vector<8x128xf32>
    %cst_100 = arith.constant 1.000000e+00 : f32
    %299 = vector.broadcast %cst_100 : f32 to vector<8x128xf32>
    %300 = arith.subf %298, %299 : vector<8x128xf32>
    %301 = arith.select %5, %300, %296 : vector<8x128xi1>, vector<8x128xf32>
    %302 = vector.extract_strided_slice %301 {offsets = [0, 0], sizes = [8, 32], strides = [1, 1]} : vector<8x128xf32> to vector<8x32xf32>
    %303 = vector.extract_strided_slice %301 {offsets = [0, 32], sizes = [8, 32], strides = [1, 1]} : vector<8x128xf32> to vector<8x32xf32>
    %304 = vector.extract_strided_slice %301 {offsets = [0, 64], sizes = [8, 32], strides = [1, 1]} : vector<8x128xf32> to vector<8x32xf32>
    %305 = vector.extract_strided_slice %301 {offsets = [0, 96], sizes = [8, 32], strides = [1, 1]} : vector<8x128xf32> to vector<8x32xf32>
    %306 = arith.mulf %303, %281 : vector<8x32xf32>
    %307 = arith.mulf %302, %304 : vector<8x32xf32>
    %308 = arith.addf %306, %307 : vector<8x32xf32>
    %309 = math.tanh %308 : vector<8x32xf32>
    %310 = arith.mulf %305, %309 : vector<8x32xf32>
    %c1_i32_101 = arith.constant 1 : i32
    %c8_i32_102 = arith.constant 8 : i32
    %311 = arith.muli %c1_i32_101, %c8_i32_102 : i32
    %312 = tpu.assume_multiple %311, 8 : i32
    %313 = arith.index_cast %312 : i32 to index
    %c0_103 = arith.constant 0 : index
    %314 = vector.load %arg13[%313, %c0_103] : memref<64x128xf32, #tpu.memory_space<vmem>>, vector<8x128xf32>
    %315 = arith.truncf %310 : vector<8x32xf32> to vector<8x32xbf16>
    %cst_104 = arith.constant dense<0.000000e+00> : vector<8x128xf32>
    %316 = tpu.matmul %315, %279, %cst_104 {dimension_numbers = #tpu.dot_dimension_numbers<[1], [0], [0], [1], [0, 0, 1, 1], [], []>} : vector<8x32xbf16>, vector<32x128xbf16>, vector<8x128xf32> -> vector<8x128xf32>
    %317 = arith.addf %314, %316 : vector<8x128xf32>
    %cst_105 = arith.constant 2.000000e+00 : f32
    %318 = vector.broadcast %cst_105 : f32 to vector<8x128xf32>
    %319 = arith.mulf %318, %317 : vector<8x128xf32>
    %320 = arith.select %5, %319, %317 : vector<8x128xi1>, vector<8x128xf32>
    %321 = arith.negf %320 : vector<8x128xf32>
    %322 = math.exp %321 : vector<8x128xf32>
    %cst_106 = arith.constant 1.000000e+00 : f32
    %323 = vector.broadcast %cst_106 : f32 to vector<8x128xf32>
    %324 = arith.addf %323, %322 : vector<8x128xf32>
    %325 = arith.divf %323, %324 : vector<8x128xf32>
    %cst_107 = arith.constant 2.000000e+00 : f32
    %326 = vector.broadcast %cst_107 : f32 to vector<8x128xf32>
    %327 = arith.mulf %326, %325 : vector<8x128xf32>
    %cst_108 = arith.constant 1.000000e+00 : f32
    %328 = vector.broadcast %cst_108 : f32 to vector<8x128xf32>
    %329 = arith.subf %327, %328 : vector<8x128xf32>
    %330 = arith.select %5, %329, %325 : vector<8x128xi1>, vector<8x128xf32>
    %331 = vector.extract_strided_slice %330 {offsets = [0, 0], sizes = [8, 32], strides = [1, 1]} : vector<8x128xf32> to vector<8x32xf32>
    %332 = vector.extract_strided_slice %330 {offsets = [0, 32], sizes = [8, 32], strides = [1, 1]} : vector<8x128xf32> to vector<8x32xf32>
    %333 = vector.extract_strided_slice %330 {offsets = [0, 64], sizes = [8, 32], strides = [1, 1]} : vector<8x128xf32> to vector<8x32xf32>
    %334 = vector.extract_strided_slice %330 {offsets = [0, 96], sizes = [8, 32], strides = [1, 1]} : vector<8x128xf32> to vector<8x32xf32>
    %335 = arith.mulf %332, %308 : vector<8x32xf32>
    %336 = arith.mulf %331, %333 : vector<8x32xf32>
    %337 = arith.addf %335, %336 : vector<8x32xf32>
    %338 = math.tanh %337 : vector<8x32xf32>
    %339 = arith.mulf %334, %338 : vector<8x32xf32>
    %c2_i32_109 = arith.constant 2 : i32
    %c8_i32_110 = arith.constant 8 : i32
    %340 = arith.muli %c2_i32_109, %c8_i32_110 : i32
    %341 = tpu.assume_multiple %340, 8 : i32
    %342 = arith.index_cast %341 : i32 to index
    %c0_111 = arith.constant 0 : index
    %343 = vector.load %arg13[%342, %c0_111] : memref<64x128xf32, #tpu.memory_space<vmem>>, vector<8x128xf32>
    %344 = arith.truncf %339 : vector<8x32xf32> to vector<8x32xbf16>
    %cst_112 = arith.constant dense<0.000000e+00> : vector<8x128xf32>
    %345 = tpu.matmul %344, %279, %cst_112 {dimension_numbers = #tpu.dot_dimension_numbers<[1], [0], [0], [1], [0, 0, 1, 1], [], []>} : vector<8x32xbf16>, vector<32x128xbf16>, vector<8x128xf32> -> vector<8x128xf32>
    %346 = arith.addf %343, %345 : vector<8x128xf32>
    %cst_113 = arith.constant 2.000000e+00 : f32
    %347 = vector.broadcast %cst_113 : f32 to vector<8x128xf32>
    %348 = arith.mulf %347, %346 : vector<8x128xf32>
    %349 = arith.select %5, %348, %346 : vector<8x128xi1>, vector<8x128xf32>
    %350 = arith.negf %349 : vector<8x128xf32>
    %351 = math.exp %350 : vector<8x128xf32>
    %cst_114 = arith.constant 1.000000e+00 : f32
    %352 = vector.broadcast %cst_114 : f32 to vector<8x128xf32>
    %353 = arith.addf %352, %351 : vector<8x128xf32>
    %354 = arith.divf %352, %353 : vector<8x128xf32>
    %cst_115 = arith.constant 2.000000e+00 : f32
    %355 = vector.broadcast %cst_115 : f32 to vector<8x128xf32>
    %356 = arith.mulf %355, %354 : vector<8x128xf32>
    %cst_116 = arith.constant 1.000000e+00 : f32
    %357 = vector.broadcast %cst_116 : f32 to vector<8x128xf32>
    %358 = arith.subf %356, %357 : vector<8x128xf32>
    %359 = arith.select %5, %358, %354 : vector<8x128xi1>, vector<8x128xf32>
    %360 = vector.extract_strided_slice %359 {offsets = [0, 0], sizes = [8, 32], strides = [1, 1]} : vector<8x128xf32> to vector<8x32xf32>
    %361 = vector.extract_strided_slice %359 {offsets = [0, 32], sizes = [8, 32], strides = [1, 1]} : vector<8x128xf32> to vector<8x32xf32>
    %362 = vector.extract_strided_slice %359 {offsets = [0, 64], sizes = [8, 32], strides = [1, 1]} : vector<8x128xf32> to vector<8x32xf32>
    %363 = vector.extract_strided_slice %359 {offsets = [0, 96], sizes = [8, 32], strides = [1, 1]} : vector<8x128xf32> to vector<8x32xf32>
    %364 = arith.mulf %361, %337 : vector<8x32xf32>
    %365 = arith.mulf %360, %362 : vector<8x32xf32>
    %366 = arith.addf %364, %365 : vector<8x32xf32>
    %367 = math.tanh %366 : vector<8x32xf32>
    %368 = arith.mulf %363, %367 : vector<8x32xf32>
    %c3_i32_117 = arith.constant 3 : i32
    %c8_i32_118 = arith.constant 8 : i32
    %369 = arith.muli %c3_i32_117, %c8_i32_118 : i32
    %370 = tpu.assume_multiple %369, 8 : i32
    %371 = arith.index_cast %370 : i32 to index
    %c0_119 = arith.constant 0 : index
    %372 = vector.load %arg13[%371, %c0_119] : memref<64x128xf32, #tpu.memory_space<vmem>>, vector<8x128xf32>
    %373 = arith.truncf %368 : vector<8x32xf32> to vector<8x32xbf16>
    %cst_120 = arith.constant dense<0.000000e+00> : vector<8x128xf32>
    %374 = tpu.matmul %373, %279, %cst_120 {dimension_numbers = #tpu.dot_dimension_numbers<[1], [0], [0], [1], [0, 0, 1, 1], [], []>} : vector<8x32xbf16>, vector<32x128xbf16>, vector<8x128xf32> -> vector<8x128xf32>
    %375 = arith.addf %372, %374 : vector<8x128xf32>
    %cst_121 = arith.constant 2.000000e+00 : f32
    %376 = vector.broadcast %cst_121 : f32 to vector<8x128xf32>
    %377 = arith.mulf %376, %375 : vector<8x128xf32>
    %378 = arith.select %5, %377, %375 : vector<8x128xi1>, vector<8x128xf32>
    %379 = arith.negf %378 : vector<8x128xf32>
    %380 = math.exp %379 : vector<8x128xf32>
    %cst_122 = arith.constant 1.000000e+00 : f32
    %381 = vector.broadcast %cst_122 : f32 to vector<8x128xf32>
    %382 = arith.addf %381, %380 : vector<8x128xf32>
    %383 = arith.divf %381, %382 : vector<8x128xf32>
    %cst_123 = arith.constant 2.000000e+00 : f32
    %384 = vector.broadcast %cst_123 : f32 to vector<8x128xf32>
    %385 = arith.mulf %384, %383 : vector<8x128xf32>
    %cst_124 = arith.constant 1.000000e+00 : f32
    %386 = vector.broadcast %cst_124 : f32 to vector<8x128xf32>
    %387 = arith.subf %385, %386 : vector<8x128xf32>
    %388 = arith.select %5, %387, %383 : vector<8x128xi1>, vector<8x128xf32>
    %389 = vector.extract_strided_slice %388 {offsets = [0, 0], sizes = [8, 32], strides = [1, 1]} : vector<8x128xf32> to vector<8x32xf32>
    %390 = vector.extract_strided_slice %388 {offsets = [0, 32], sizes = [8, 32], strides = [1, 1]} : vector<8x128xf32> to vector<8x32xf32>
    %391 = vector.extract_strided_slice %388 {offsets = [0, 64], sizes = [8, 32], strides = [1, 1]} : vector<8x128xf32> to vector<8x32xf32>
    %392 = vector.extract_strided_slice %388 {offsets = [0, 96], sizes = [8, 32], strides = [1, 1]} : vector<8x128xf32> to vector<8x32xf32>
    %393 = arith.mulf %390, %366 : vector<8x32xf32>
    %394 = arith.mulf %389, %391 : vector<8x32xf32>
    %395 = arith.addf %393, %394 : vector<8x32xf32>
    %396 = math.tanh %395 : vector<8x32xf32>
    %397 = arith.mulf %392, %396 : vector<8x32xf32>
    %c4_i32_125 = arith.constant 4 : i32
    %c8_i32_126 = arith.constant 8 : i32
    %398 = arith.muli %c4_i32_125, %c8_i32_126 : i32
    %399 = tpu.assume_multiple %398, 8 : i32
    %400 = arith.index_cast %399 : i32 to index
    %c0_127 = arith.constant 0 : index
    %401 = vector.load %arg13[%400, %c0_127] : memref<64x128xf32, #tpu.memory_space<vmem>>, vector<8x128xf32>
    %402 = arith.truncf %397 : vector<8x32xf32> to vector<8x32xbf16>
    %cst_128 = arith.constant dense<0.000000e+00> : vector<8x128xf32>
    %403 = tpu.matmul %402, %279, %cst_128 {dimension_numbers = #tpu.dot_dimension_numbers<[1], [0], [0], [1], [0, 0, 1, 1], [], []>} : vector<8x32xbf16>, vector<32x128xbf16>, vector<8x128xf32> -> vector<8x128xf32>
    %404 = arith.addf %401, %403 : vector<8x128xf32>
    %cst_129 = arith.constant 2.000000e+00 : f32
    %405 = vector.broadcast %cst_129 : f32 to vector<8x128xf32>
    %406 = arith.mulf %405, %404 : vector<8x128xf32>
    %407 = arith.select %5, %406, %404 : vector<8x128xi1>, vector<8x128xf32>
    %408 = arith.negf %407 : vector<8x128xf32>
    %409 = math.exp %408 : vector<8x128xf32>
    %cst_130 = arith.constant 1.000000e+00 : f32
    %410 = vector.broadcast %cst_130 : f32 to vector<8x128xf32>
    %411 = arith.addf %410, %409 : vector<8x128xf32>
    %412 = arith.divf %410, %411 : vector<8x128xf32>
    %cst_131 = arith.constant 2.000000e+00 : f32
    %413 = vector.broadcast %cst_131 : f32 to vector<8x128xf32>
    %414 = arith.mulf %413, %412 : vector<8x128xf32>
    %cst_132 = arith.constant 1.000000e+00 : f32
    %415 = vector.broadcast %cst_132 : f32 to vector<8x128xf32>
    %416 = arith.subf %414, %415 : vector<8x128xf32>
    %417 = arith.select %5, %416, %412 : vector<8x128xi1>, vector<8x128xf32>
    %418 = vector.extract_strided_slice %417 {offsets = [0, 0], sizes = [8, 32], strides = [1, 1]} : vector<8x128xf32> to vector<8x32xf32>
    %419 = vector.extract_strided_slice %417 {offsets = [0, 32], sizes = [8, 32], strides = [1, 1]} : vector<8x128xf32> to vector<8x32xf32>
    %420 = vector.extract_strided_slice %417 {offsets = [0, 64], sizes = [8, 32], strides = [1, 1]} : vector<8x128xf32> to vector<8x32xf32>
    %421 = vector.extract_strided_slice %417 {offsets = [0, 96], sizes = [8, 32], strides = [1, 1]} : vector<8x128xf32> to vector<8x32xf32>
    %422 = arith.mulf %419, %395 : vector<8x32xf32>
    %423 = arith.mulf %418, %420 : vector<8x32xf32>
    %424 = arith.addf %422, %423 : vector<8x32xf32>
    %425 = math.tanh %424 : vector<8x32xf32>
    %426 = arith.mulf %421, %425 : vector<8x32xf32>
    %c5_i32_133 = arith.constant 5 : i32
    %c8_i32_134 = arith.constant 8 : i32
    %427 = arith.muli %c5_i32_133, %c8_i32_134 : i32
    %428 = tpu.assume_multiple %427, 8 : i32
    %429 = arith.index_cast %428 : i32 to index
    %c0_135 = arith.constant 0 : index
    %430 = vector.load %arg13[%429, %c0_135] : memref<64x128xf32, #tpu.memory_space<vmem>>, vector<8x128xf32>
    %431 = arith.truncf %426 : vector<8x32xf32> to vector<8x32xbf16>
    %cst_136 = arith.constant dense<0.000000e+00> : vector<8x128xf32>
    %432 = tpu.matmul %431, %279, %cst_136 {dimension_numbers = #tpu.dot_dimension_numbers<[1], [0], [0], [1], [0, 0, 1, 1], [], []>} : vector<8x32xbf16>, vector<32x128xbf16>, vector<8x128xf32> -> vector<8x128xf32>
    %433 = arith.addf %430, %432 : vector<8x128xf32>
    %cst_137 = arith.constant 2.000000e+00 : f32
    %434 = vector.broadcast %cst_137 : f32 to vector<8x128xf32>
    %435 = arith.mulf %434, %433 : vector<8x128xf32>
    %436 = arith.select %5, %435, %433 : vector<8x128xi1>, vector<8x128xf32>
    %437 = arith.negf %436 : vector<8x128xf32>
    %438 = math.exp %437 : vector<8x128xf32>
    %cst_138 = arith.constant 1.000000e+00 : f32
    %439 = vector.broadcast %cst_138 : f32 to vector<8x128xf32>
    %440 = arith.addf %439, %438 : vector<8x128xf32>
    %441 = arith.divf %439, %440 : vector<8x128xf32>
    %cst_139 = arith.constant 2.000000e+00 : f32
    %442 = vector.broadcast %cst_139 : f32 to vector<8x128xf32>
    %443 = arith.mulf %442, %441 : vector<8x128xf32>
    %cst_140 = arith.constant 1.000000e+00 : f32
    %444 = vector.broadcast %cst_140 : f32 to vector<8x128xf32>
    %445 = arith.subf %443, %444 : vector<8x128xf32>
    %446 = arith.select %5, %445, %441 : vector<8x128xi1>, vector<8x128xf32>
    %447 = vector.extract_strided_slice %446 {offsets = [0, 0], sizes = [8, 32], strides = [1, 1]} : vector<8x128xf32> to vector<8x32xf32>
    %448 = vector.extract_strided_slice %446 {offsets = [0, 32], sizes = [8, 32], strides = [1, 1]} : vector<8x128xf32> to vector<8x32xf32>
    %449 = vector.extract_strided_slice %446 {offsets = [0, 64], sizes = [8, 32], strides = [1, 1]} : vector<8x128xf32> to vector<8x32xf32>
    %450 = vector.extract_strided_slice %446 {offsets = [0, 96], sizes = [8, 32], strides = [1, 1]} : vector<8x128xf32> to vector<8x32xf32>
    %451 = arith.mulf %448, %424 : vector<8x32xf32>
    %452 = arith.mulf %447, %449 : vector<8x32xf32>
    %453 = arith.addf %451, %452 : vector<8x32xf32>
    %454 = math.tanh %453 : vector<8x32xf32>
    %455 = arith.mulf %450, %454 : vector<8x32xf32>
    %c6_i32_141 = arith.constant 6 : i32
    %c8_i32_142 = arith.constant 8 : i32
    %456 = arith.muli %c6_i32_141, %c8_i32_142 : i32
    %457 = tpu.assume_multiple %456, 8 : i32
    %458 = arith.index_cast %457 : i32 to index
    %c0_143 = arith.constant 0 : index
    %459 = vector.load %arg13[%458, %c0_143] : memref<64x128xf32, #tpu.memory_space<vmem>>, vector<8x128xf32>
    %460 = arith.truncf %455 : vector<8x32xf32> to vector<8x32xbf16>
    %cst_144 = arith.constant dense<0.000000e+00> : vector<8x128xf32>
    %461 = tpu.matmul %460, %279, %cst_144 {dimension_numbers = #tpu.dot_dimension_numbers<[1], [0], [0], [1], [0, 0, 1, 1], [], []>} : vector<8x32xbf16>, vector<32x128xbf16>, vector<8x128xf32> -> vector<8x128xf32>
    %462 = arith.addf %459, %461 : vector<8x128xf32>
    %cst_145 = arith.constant 2.000000e+00 : f32
    %463 = vector.broadcast %cst_145 : f32 to vector<8x128xf32>
    %464 = arith.mulf %463, %462 : vector<8x128xf32>
    %465 = arith.select %5, %464, %462 : vector<8x128xi1>, vector<8x128xf32>
    %466 = arith.negf %465 : vector<8x128xf32>
    %467 = math.exp %466 : vector<8x128xf32>
    %cst_146 = arith.constant 1.000000e+00 : f32
    %468 = vector.broadcast %cst_146 : f32 to vector<8x128xf32>
    %469 = arith.addf %468, %467 : vector<8x128xf32>
    %470 = arith.divf %468, %469 : vector<8x128xf32>
    %cst_147 = arith.constant 2.000000e+00 : f32
    %471 = vector.broadcast %cst_147 : f32 to vector<8x128xf32>
    %472 = arith.mulf %471, %470 : vector<8x128xf32>
    %cst_148 = arith.constant 1.000000e+00 : f32
    %473 = vector.broadcast %cst_148 : f32 to vector<8x128xf32>
    %474 = arith.subf %472, %473 : vector<8x128xf32>
    %475 = arith.select %5, %474, %470 : vector<8x128xi1>, vector<8x128xf32>
    %476 = vector.extract_strided_slice %475 {offsets = [0, 0], sizes = [8, 32], strides = [1, 1]} : vector<8x128xf32> to vector<8x32xf32>
    %477 = vector.extract_strided_slice %475 {offsets = [0, 32], sizes = [8, 32], strides = [1, 1]} : vector<8x128xf32> to vector<8x32xf32>
    %478 = vector.extract_strided_slice %475 {offsets = [0, 64], sizes = [8, 32], strides = [1, 1]} : vector<8x128xf32> to vector<8x32xf32>
    %479 = vector.extract_strided_slice %475 {offsets = [0, 96], sizes = [8, 32], strides = [1, 1]} : vector<8x128xf32> to vector<8x32xf32>
    %480 = arith.mulf %477, %453 : vector<8x32xf32>
    %481 = arith.mulf %476, %478 : vector<8x32xf32>
    %482 = arith.addf %480, %481 : vector<8x32xf32>
    %483 = math.tanh %482 : vector<8x32xf32>
    %484 = arith.mulf %479, %483 : vector<8x32xf32>
    %c7_i32_149 = arith.constant 7 : i32
    %c8_i32_150 = arith.constant 8 : i32
    %485 = arith.muli %c7_i32_149, %c8_i32_150 : i32
    %486 = tpu.assume_multiple %485, 8 : i32
    %487 = arith.index_cast %486 : i32 to index
    %c0_151 = arith.constant 0 : index
    %488 = vector.load %arg13[%487, %c0_151] : memref<64x128xf32, #tpu.memory_space<vmem>>, vector<8x128xf32>
    %489 = arith.truncf %484 : vector<8x32xf32> to vector<8x32xbf16>
    %cst_152 = arith.constant dense<0.000000e+00> : vector<8x128xf32>
    %490 = tpu.matmul %489, %279, %cst_152 {dimension_numbers = #tpu.dot_dimension_numbers<[1], [0], [0], [1], [0, 0, 1, 1], [], []>} : vector<8x32xbf16>, vector<32x128xbf16>, vector<8x128xf32> -> vector<8x128xf32>
    %491 = arith.addf %488, %490 : vector<8x128xf32>
    %cst_153 = arith.constant 2.000000e+00 : f32
    %492 = vector.broadcast %cst_153 : f32 to vector<8x128xf32>
    %493 = arith.mulf %492, %491 : vector<8x128xf32>
    %494 = arith.select %5, %493, %491 : vector<8x128xi1>, vector<8x128xf32>
    %495 = arith.negf %494 : vector<8x128xf32>
    %496 = math.exp %495 : vector<8x128xf32>
    %cst_154 = arith.constant 1.000000e+00 : f32
    %497 = vector.broadcast %cst_154 : f32 to vector<8x128xf32>
    %498 = arith.addf %497, %496 : vector<8x128xf32>
    %499 = arith.divf %497, %498 : vector<8x128xf32>
    %cst_155 = arith.constant 2.000000e+00 : f32
    %500 = vector.broadcast %cst_155 : f32 to vector<8x128xf32>
    %501 = arith.mulf %500, %499 : vector<8x128xf32>
    %cst_156 = arith.constant 1.000000e+00 : f32
    %502 = vector.broadcast %cst_156 : f32 to vector<8x128xf32>
    %503 = arith.subf %501, %502 : vector<8x128xf32>
    %504 = arith.select %5, %503, %499 : vector<8x128xi1>, vector<8x128xf32>
    %505 = vector.extract_strided_slice %504 {offsets = [0, 0], sizes = [8, 32], strides = [1, 1]} : vector<8x128xf32> to vector<8x32xf32>
    %506 = vector.extract_strided_slice %504 {offsets = [0, 32], sizes = [8, 32], strides = [1, 1]} : vector<8x128xf32> to vector<8x32xf32>
    %507 = vector.extract_strided_slice %504 {offsets = [0, 64], sizes = [8, 32], strides = [1, 1]} : vector<8x128xf32> to vector<8x32xf32>
    %508 = vector.extract_strided_slice %504 {offsets = [0, 96], sizes = [8, 32], strides = [1, 1]} : vector<8x128xf32> to vector<8x32xf32>
    %509 = arith.mulf %506, %482 : vector<8x32xf32>
    %510 = arith.mulf %505, %507 : vector<8x32xf32>
    %511 = arith.addf %509, %510 : vector<8x32xf32>
    %512 = math.tanh %511 : vector<8x32xf32>
    %513 = arith.mulf %508, %512 : vector<8x32xf32>
    %c8_i32_157 = arith.constant 8 : i32
    %cst_158 = arith.constant 0.000000e+00 : f32
    %514 = vector.broadcast %cst_158 : f32 to vector<8x32xf32>
    %515 = arith.maximumf %513, %514 : vector<8x32xf32>
    %516 = arith.truncf %515 : vector<8x32xf32> to vector<8x32xbf16>
    %c0_159 = arith.constant 0 : index
    %c0_160 = arith.constant 0 : index
    %517 = vector.load %arg5[%c0_159, %c0_160] : memref<32x16xbf16, #tpu.memory_space<vmem>>, vector<32x16xbf16>
    %cst_161 = arith.constant dense<0.000000e+00> : vector<8x16xf32>
    %518 = tpu.matmul %516, %517, %cst_161 {dimension_numbers = #tpu.dot_dimension_numbers<[1], [0], [0], [1], [0, 0, 1, 1], [], []>} : vector<8x32xbf16>, vector<32x16xbf16>, vector<8x16xf32> -> vector<8x16xf32>
    %c0_162 = arith.constant 0 : index
    %c0_163 = arith.constant 0 : index
    %519 = vector.load %arg6[%c0_162, %c0_163] : memref<1x16xf32, #tpu.memory_space<vmem>>, vector<1x16xf32>
    %520 = vector.broadcast %519 : vector<1x16xf32> to vector<8x16xf32>
    %521 = arith.addf %518, %520 : vector<8x16xf32>
    %522 = arith.truncf %521 : vector<8x16xf32> to vector<8x16xbf16>
    %c0_164 = arith.constant 0 : index
    %c0_165 = arith.constant 0 : index
    %523 = vector.load %arg7[%c0_164, %c0_165] : memref<16x16xbf16, #tpu.memory_space<vmem>>, vector<16x16xbf16>
    %cst_166 = arith.constant dense<0.000000e+00> : vector<8x16xf32>
    %524 = tpu.matmul %522, %523, %cst_166 {dimension_numbers = #tpu.dot_dimension_numbers<[1], [0], [0], [1], [0, 0, 1, 1], [], []>} : vector<8x16xbf16>, vector<16x16xbf16>, vector<8x16xf32> -> vector<8x16xf32>
    %c0_167 = arith.constant 0 : index
    %c0_168 = arith.constant 0 : index
    %525 = vector.load %arg8[%c0_167, %c0_168] : memref<1x16xf32, #tpu.memory_space<vmem>>, vector<1x16xf32>
    %526 = vector.broadcast %525 : vector<1x16xf32> to vector<8x16xf32>
    %527 = arith.addf %524, %526 : vector<8x16xf32>
    %528 = arith.truncf %527 : vector<8x16xf32> to vector<8x16xbf16>
    %c0_169 = arith.constant 0 : index
    %c0_170 = arith.constant 0 : index
    %529 = vector.load %arg9[%c0_169, %c0_170] : memref<16x4xbf16, #tpu.memory_space<vmem>>, vector<16x4xbf16>
    %cst_171 = arith.constant dense<0.000000e+00> : vector<8x4xf32>
    %530 = tpu.matmul %528, %529, %cst_171 {dimension_numbers = #tpu.dot_dimension_numbers<[1], [0], [0], [1], [0, 0, 1, 1], [], []>} : vector<8x16xbf16>, vector<16x4xbf16>, vector<8x4xf32> -> vector<8x4xf32>
    %c0_172 = arith.constant 0 : index
    %c0_173 = arith.constant 0 : index
    %531 = vector.load %arg10[%c0_172, %c0_173] : memref<1x4xf32, #tpu.memory_space<vmem>>, vector<1x4xf32>
    %532 = vector.broadcast %531 : vector<1x4xf32> to vector<8x4xf32>
    %533 = arith.addf %530, %532 : vector<8x4xf32>
    %534 = vector.extract_strided_slice %533 {offsets = [0, 0], sizes = [2, 4], strides = [1, 1]} : vector<8x4xf32> to vector<2x4xf32>
    %c0_174 = arith.constant 0 : index
    %c0_175 = arith.constant 0 : index
    %535 = vector.load %arg11[%c0_174, %c0_175] : memref<2x4xf32, #tpu.memory_space<vmem>>, vector<2x4xf32>
    tpu.vector_store %arg11[%c0_174, %c0_175], %534 {strides = array<i32>} : memref<2x4xf32, #tpu.memory_space<vmem>>, vector<2x4xf32>,
    return
  }
  func.func @transform_0(%arg0: i32) -> (i32, i32) {
    %c0_i32 = arith.constant 0 : i32
    %c0_i32_0 = arith.constant 0 : i32
    %c0_i32_1 = arith.constant 0 : i32
    return %c0_i32, %c0_i32_0 : i32, i32
  }
  func.func @transform_1(%arg0: i32) -> (i32, i32, i32) {
    %c0_i32 = arith.constant 0 : i32
    %c0_i32_0 = arith.constant 0 : i32
    %c0_i32_1 = arith.constant 0 : i32
    %c0_i32_2 = arith.constant 0 : i32
    return %c0_i32, %c0_i32_0, %c0_i32_1 : i32, i32, i32
  }
  func.func @transform_2(%arg0: i32) -> (i32, i32, i32) {
    %c0_i32 = arith.constant 0 : i32
    %c0_i32_0 = arith.constant 0 : i32
    %c0_i32_1 = arith.constant 0 : i32
    %c0_i32_2 = arith.constant 0 : i32
    return %c0_i32, %c0_i32_0, %c0_i32_1 : i32, i32, i32
  }
  func.func @transform_3(%arg0: i32) -> (i32, i32, i32) {
    %c0_i32 = arith.constant 0 : i32
    %c0_i32_0 = arith.constant 0 : i32
    %c0_i32_1 = arith.constant 0 : i32
    %c0_i32_2 = arith.constant 0 : i32
    return %c0_i32, %c0_i32_0, %c0_i32_1 : i32, i32, i32
  }
  func.func @transform_4(%arg0: i32) -> (i32, i32) {
    %c0_i32 = arith.constant 0 : i32
    %c0_i32_0 = arith.constant 0 : i32
    %c0_i32_1 = arith.constant 0 : i32
    return %c0_i32, %c0_i32_0 : i32, i32
  }
  func.func @transform_5(%arg0: i32) -> (i32, i32) {
    %c0_i32 = arith.constant 0 : i32
    %c0_i32_0 = arith.constant 0 : i32
    %c0_i32_1 = arith.constant 0 : i32
    return %c0_i32, %c0_i32_0 : i32, i32
  }
  func.func @transform_6(%arg0: i32) -> (i32, i32) {
    %c0_i32 = arith.constant 0 : i32
    %c0_i32_0 = arith.constant 0 : i32
    %c0_i32_1 = arith.constant 0 : i32
    return %c0_i32, %c0_i32_0 : i32, i32
  }
  func.func @transform_7(%arg0: i32) -> (i32, i32) {
    %c0_i32 = arith.constant 0 : i32
    %c0_i32_0 = arith.constant 0 : i32
    %c0_i32_1 = arith.constant 0 : i32
    return %c0_i32, %c0_i32_0 : i32, i32
  }
  func.func @transform_8(%arg0: i32) -> (i32, i32) {
    %c0_i32 = arith.constant 0 : i32
    %c0_i32_0 = arith.constant 0 : i32
    %c0_i32_1 = arith.constant 0 : i32
    return %c0_i32, %c0_i32_0 : i32, i32
  }
  func.func @transform_9(%arg0: i32) -> (i32, i32) {
    %c0_i32 = arith.constant 0 : i32
    %c0_i32_0 = arith.constant 0 : i32
    %c0_i32_1 = arith.constant 0 : i32
    return %c0_i32, %c0_i32_0 : i32, i32
  }
  func.func @transform_10(%arg0: i32) -> (i32, i32) {
    %c0_i32 = arith.constant 0 : i32
    %c0_i32_0 = arith.constant 0 : i32
    %c0_i32_1 = arith.constant 0 : i32
    return %c0_i32, %c0_i32_0 : i32, i32
  }
}

</mosaic_0001>

<bundles_post_ra>
// kernel: regression_lstm_forward.1
= control target key start
LH: loop header
LB: loop body
LE: loop exit
PB: predicated region body
PF: predicated region fallthrough
CT: control target
= control target key end

     0   :  { %v2259_v1 = vmov 0.0   ;;  %vm77_vm0 = vcmask 261120   ;;  %vm2260_vm1 = vmmov 0   ;;  %v2261_v11 = vmov 0   ;;  %s2791_s0 = inlined_call_operand.vmem [shape: f32[64,32], index: 0, kind: input, shape index: {}]   ;;  %s2792_s1 = inlined_call_operand.vmem [shape: bf16[2,32,128], index: 1, kind: input, shape index: {}]   ;;  %s2793_s2 = inlined_call_operand.vmem [shape: bf16[2,32,128], index: 2, kind: input, shape index: {}]   ;;  %s2794_s3 = inlined_call_operand.vmem [shape: f32[2,1,128], index: 3, kind: input, shape index: {}]   ;;  %s2795_s4 = inlined_call_operand.vmem [shape: bf16[32,16], index: 4, kind: input, shape index: {}]   ;;  %s2796_s5 = inlined_call_operand.vmem [shape: f32[1,16], index: 5, kind: input, shape index: {}]   ;;  %s2797_s6 = inlined_call_operand.vmem [shape: bf16[16,16], index: 6, kind: input, shape index: {}]   ;;  %s2798_s7 = inlined_call_operand.vmem [shape: f32[1,16], index: 7, kind: input, shape index: {}]   ;;  %s2799_s8 = inlined_call_operand.vmem [shape: bf16[16,4], index: 8, kind: input, shape index: {}]   ;;  %s2800_s9 = inlined_call_operand.vmem [shape: f32[1,4], index: 9, kind: input, shape index: {}]   ;;  %s2801_s10 = inlined_call_operand.hbm [shape: f32[2,4], index: 10, kind: output, shape index: {}]  }
   0x1   :  { %v2127_v0 = vld [vmem:[%s2792_s1] sm:$0xff]   ;;  %1961 = vmatprep.subr.bf16.mxu1 %v2259_v1  ;;  %v2129_v3 = vld [vmem:[%s2792_s1 + $0x8] sm:$0xff]   ;;  %v44_v7 = vld [vmem:[%s2791_s0 + $0x10] sm:$0xff]  ;;  %1965 = vmatprep.mubr.msk.bf16.mxu1 %vm2260_vm1, %v2259_v1 }
   0x2   :  { %v2327_v2 = vld [vmem:[%s2793_s2] sm:$0xff]   ;;  %1949 = vmatprep.subr.bf16.mxu0 %v2127_v0  ;;  %v2336_v4 = vld [vmem:[%s2793_s2 + $0x8] sm:$0xff]   ;;  %v45_v9 = vld [vmem:[%s2791_s0 + $0x18] sm:$0xff] }
   0x3   :  { %1950 = vmatpush3.bf16.msra.mxu0 %v2127_v0  ;;  %1962 = vmatpush3.bf16.msra.mxu1 %v2327_v2  ;;  %v42_v5 = vld [vmem:[%s2791_s0] sm:$0xff]  ;;  %v43_v6 = vld [vmem:[%s2791_s0 + $0x8] sm:$0xff]  ;;  %v51_v10 = vpack.c.bf16 %v45_v9, %v44_v7 }
   0x4   :  { %1951 = vmatprep.subr.bf16.mxu0 %v2129_v3  ;;  %1963 = vmatprep.subr.bf16.mxu1 %v2259_v1  ;;  %v50_v8 = vpack.c.bf16 %v43_v6, %v42_v5 }
   0x6   :  { %1953 = vmatprep.mubr.msk.bf16.mxu0 %vm77_vm0, %v50_v8 }
   0x7   :  { %1952 = vmatpush3.bf16.msra.mxu0 %v2129_v3  ;;  %1964 = vmatpush3.bf16.msra.mxu1 %v2336_v4 }
   0x8   :  { %1969 = vmatprep.subr.bf16.mxu1 %v2259_v1  ;;  %1977 = vmatprep.subr.bf16.mxu0 %v2259_v1 }
   0xa   :  { %1954 = vmatmul.mubr.msk.bf16.vlgmr.msra.gmra.mrb[0].mxu0 %vm77_vm0, %v51_v10  ;;  %1966 = vmatmul.mubr.bf16.vlgmr.msra.gmra.mrb[0].mxu1 %v2261_v11 }
   0xb   :  { %15 = vsyncpa [#allocation5], 0  ;;  %1970 = vmatpush3.bf16.msra.mxu1 %v2327_v2  ;;  %1973 = vmatprep.mubr.msk.bf16.mxu1 %vm2260_vm1, %v2259_v1  ;;  %v37_v12 = vlaneseq  ;;  %v2372_v14 = vld [vmem:[%s2794_s3] ss:$0 sm:$0xff]  ;;  %s2262_s11 = smov 64   ;;  %s2263_s12 = smov 32  }
   0xc   :  { %1971 = vmatprep.subr.bf16.mxu1 %v2259_v1  ;;  %1978 = vmatpush3.bf16.msra.mxu0 %v2327_v2  ;;  %v46_v3 = vld [vmem:[%s2791_s0 + $0x20] sm:$0xff]  ;;  %v47_v5 = vld [vmem:[%s2791_s0 + $0x28] sm:$0xff]  ;;  %v48_v6 = vld [vmem:[%s2791_s0 + $0x30] sm:$0xff]  ;;  %vm1680_vm5 = vcmask 130048   ;;  %s2264_s17 = smov [#allocation4]   ;;  %vm1783_vm6 = vcmask 25600  }
   0xd   :  { %1979 = vmatprep.subr.bf16.mxu0 %v2259_v1  ;;  %v38_v13 = vand.u32 127, %v37_v12  ;;  %v52_v7 = vpack.c.bf16 %v47_v5, %v46_v3  ;;  %v49_v8 = vld [vmem:[%s2791_s0 + $0x38] sm:$0xff]  ;;  %v2136_v25 = vld [vmem:[%s2795_s4 + $0x8] sm:$0xff]   ;;  %s1791_s18 = sshll.u32 %s2264_s17, 4  ;;  %s1792_s18 = int_to_ptr.vmem [resolvable:$true] %s1791_s18 }
   0xe   :  { %v53_v9 = vpack.c.bf16 %v49_v8, %v48_v6  ;;  %p2240_p1 = scmp.lt.s32.totalorder %s1792_s18, %s1792_s18 }
   0xf   :  { %1972 = vmatpush3.bf16.msra.mxu1 %v2336_v4  ;;  %vm39_vm2 = vcmp.ge.s32.totalorder %v38_v13, 64  ;;  %vm40_vm3 = vcmp.lt.s32.totalorder %v38_v13, 96  ;;  %1957 = vmatprep.mubr.msk.bf16.mxu0 %vm77_vm0, %v52_v7 }
  0x10   :  { %1980 = vmatpush3.bf16.msra.mxu0 %v2336_v4  ;;  %1985 = vmatprep.subr.bf16.mxu1 %v2259_v1  ;;  %vm2379_vm4 = vmand %vm39_vm2, %vm40_vm3 }
  0x11   :  { %1993 = vmatprep.subr.bf16.mxu0 %v2259_v1 }
  0x12   :  { %1958 = vmatmul.mubr.msk.bf16.gmra.mrb[4].mxu0 %vm77_vm0, %v53_v9 }
  0x13   :  { %1981 = vmatprep.mubr.msk.bf16.mxu0 %vm2260_vm1, %v2259_v1 }
  0xdd   :  { %v2374_v15 = vpop.f32.mrb[0].mxu0  ;;  %v217_v16 = vpop.f32.mrb[0].mxu1 }
  0xde   :  { %v124_v17 = vpop.f32.mrb[1].mxu0  ;;  %v1967_v18 = vpop.f32.mrb[1].mxu1 }
  0xdf   :  { %v125_v19 = vadd.f32 %v2372_v14, %v124_v17  ;;  %v2377_v20 = vpop.f32.mrb[2].mxu0  ;;  %v220_v21 = vpop.f32.mrb[2].mxu1 }
  0xe0   :  { %v127_v22 = vpop.f32.mrb[3].mxu0  ;;  %v1968_v23 = vpop.f32.mrb[3].mxu1 }
  0xe1   :  { %v223_v24 = vadd.f32 %v217_v16, %v125_v19  ;;  %v128_v45 = vadd.f32 %v2372_v14, %v127_v22  ;;  %v133_v23 = vadd.f32 %v2374_v15, %v2372_v14 }
  0xe3   :  { %v224_v26 = vmul.f32 2.0, %v223_v24 }
  0xe5   :  { %v225_v27 = vsel %vm2379_vm4, %v224_v26, %v223_v24  ;;  %v2431_v17 = vpop.f32.mrb[4].mxu0 }
  0xe6   :  { %v1808_v28 = vmul.f32 -1.442695, %v225_v27  ;;  %v2433_v18 = vpop.f32.mrb[5].mxu0 }
  0xe7   :  { %v2435_v19 = vpop.f32.mrb[6].mxu0 }
  0xe8   :  { %2139 = vpow2.f32 %v1808_v28  ;;  %v2437_v21 = vpop.f32.mrb[7].mxu0 }
  0xf2   :  { %v2140_v29 = vpop.eup %2139 }
  0xf3   :  { %v229_v30 = vadd.f32 1.0, %v2140_v29 }
  0xf5   :  { %2141 = vrcp.f32 %v229_v30 }
  0xff   :  { %v2142_v31 = vpop.eup %2141 }
 0x100   :  { %v232_v32 = vmul.f32 2.0, %v2142_v31 }
 0x102   :  { %v1809_v33 = vadd.f32 -1.0, %v232_v32 }
 0x104   :  { %v234_v34 = vsel %vm2379_vm4, %v1809_v33, %v2142_v31 }
 0x105   :  { %237 = vrot.lane.b32.xlu0 %v234_v34, %s2262_s11  ;;  %v235_v37 = vmul.f32 0.0, %v234_v34 }
 0x177   :  { %v238_v35 = vpop.permute.xlu0 %237 }
 0x178   :  { %v240_v36 = vmul.f32 %v238_v35, %v234_v34 }
 0x17a   :  { %242 = vrot.lane.b32.xlu0 %v240_v36, %s2263_s12 }
 0x1ec   :  { %v243_v38 = vpop.permute.xlu0 %242 }
 0x1ed   :  { %v245_v39 = vadd.f32 %v243_v38, %v235_v37 }
 0x1ef   :  { %2143 = vtanh.f32 %v245_v39 }
 0x1f9   :  { %v2144_v40 = vpop.eup %2143 }
 0x1fa   :  { %248 = vrot.lane.b32.xlu1 %v2144_v40, %s2262_s11 }
 0x26c   :  { %v249_v41 = vpop.permute.xlu1 %248 }
 0x26d   :  { %v2390_v42 = vmul.f32 %v249_v41, %v234_v34 }
 0x26f   :  { %v259_v43 = vpack.c.bf16 %v2390_v42, %v2390_v42 }
 0x271   :  { %261 = vrot.lane.b32.xlu1 %v259_v43, %s2263_s12 }
 0x2e3   :  { %v262_v44 = vpop.permute.xlu1 %261 }
 0x2e4   :  { %1974 = vmatmul.mubr.msk.bf16.vlgmr.msra.gmra.mrb[4].mxu1 %vm77_vm0, %v262_v44 }
 0x2e5   :  { %1986 = vmatpush3.bf16.msra.mxu1 %v2327_v2  ;;  %1989 = vmatprep.mubr.msk.bf16.mxu1 %vm2260_vm1, %v2259_v1 }
 0x2e6   :  { %1987 = vmatprep.subr.bf16.mxu1 %v2259_v1 }
 0x2e9   :  { %1988 = vmatpush3.bf16.msra.mxu1 %v2336_v4 }
 0x2ea   :  { %2001 = vmatprep.subr.bf16.mxu1 %v2259_v1 }
 0x3b7   :  { %v300_v46 = vpop.f32.mrb[4].mxu1 }
 0x3b8   :  { %v306_v47 = vadd.f32 %v300_v46, %v128_v45  ;;  %v1975_v48 = vpop.f32.mrb[5].mxu1 }
 0x3b9   :  { %v303_v49 = vpop.f32.mrb[6].mxu1 }
 0x3ba   :  { %v307_v50 = vmul.f32 2.0, %v306_v47  ;;  %v1976_v51 = vpop.f32.mrb[7].mxu1  ;;  %v136_v49 = vadd.f32 %v2377_v20, %v2372_v14 }
 0x3bc   :  { %v308_v52 = vsel %vm2379_vm4, %v307_v50, %v306_v47 }
 0x3bd   :  { %v1811_v53 = vmul.f32 -1.442695, %v308_v52 }
 0x3bf   :  { %2145 = vpow2.f32 %v1811_v53 }
 0x3c9   :  { %v2146_v54 = vpop.eup %2145 }
 0x3ca   :  { %v312_v55 = vadd.f32 1.0, %v2146_v54 }
 0x3cc   :  { %2147 = vrcp.f32 %v312_v55 }
 0x3d6   :  { %v2148_v56 = vpop.eup %2147 }
 0x3d7   :  { %v315_v57 = vmul.f32 2.0, %v2148_v56 }
 0x3d9   :  { %v1812_v58 = vadd.f32 -1.0, %v315_v57 }
 0x3db   :  { %v317_v59 = vsel %vm2379_vm4, %v1812_v58, %v2148_v56 }
 0x3dc   :  { %320 = vrot.lane.b32.xlu0 %v317_v59, %s2262_s11  ;;  %v318_v62 = vmul.f32 %v317_v59, %v245_v39 }
 0x44e   :  { %v321_v60 = vpop.permute.xlu0 %320 }
 0x44f   :  { %v323_v61 = vmul.f32 %v321_v60, %v317_v59 }
 0x451   :  { %325 = vrot.lane.b32.xlu1 %v323_v61, %s2263_s12 }
 0x4c3   :  { %v326_v63 = vpop.permute.xlu1 %325 }
 0x4c4   :  { %v328_v0 = vadd.f32 %v326_v63, %v318_v62 }
 0x4c6   :  { %2149 = vtanh.f32 %v328_v0 }
 0x4d0   :  { %v2150_v10 = vpop.eup %2149 }
 0x4d1   :  { %331 = vrot.lane.b32.xlu0 %v2150_v10, %s2262_s11 }
 0x543   :  { %v332_v12 = vpop.permute.xlu0 %331 }
 0x544   :  { %v2426_v13 = vmul.f32 %v332_v12, %v317_v59 }
 0x546   :  { %v343_v16 = vpack.c.bf16 %v2426_v13, %v2426_v13 }
 0x548   :  { %345 = vrot.lane.b32.xlu1 %v343_v16, %s2263_s12  ;;  %v141_v16 = vadd.f32 %v2372_v14, %v2433_v18 }
 0x5ba   :  { %v346_v22 = vpop.permute.xlu1 %345 }
 0x5bb   :  { %1982 = vmatmul.mubr.msk.bf16.vlgmr.msra.gmra.mrb[8].mxu0 %vm77_vm0, %v346_v22 }
 0x5bc   :  { %1994 = vmatpush3.bf16.msra.mxu0 %v2327_v2  ;;  %1997 = vmatprep.mubr.msk.bf16.mxu0 %vm2260_vm1, %v2259_v1 }
 0x5bd   :  { %1995 = vmatprep.subr.bf16.mxu0 %v2259_v1 }
 0x5c0   :  { %1996 = vmatpush3.bf16.msra.mxu0 %v2336_v4 }
 0x5c1   :  { %2009 = vmatprep.subr.bf16.mxu0 %v2259_v1 }
 0x68e   :  { %v384_v24 = vpop.f32.mrb[8].mxu0 }
 0x68f   :  { %v390_v26 = vadd.f32 %v384_v24, %v133_v23  ;;  %v1983_v27 = vpop.f32.mrb[9].mxu0 }
 0x690   :  { %v387_v28 = vpop.f32.mrb[10].mxu0 }
 0x691   :  { %v391_v29 = vmul.f32 2.0, %v390_v26  ;;  %v1984_v30 = vpop.f32.mrb[11].mxu0 }
 0x693   :  { %v392_v31 = vsel %vm2379_vm4, %v391_v29, %v390_v26 }
 0x694   :  { %v1814_v32 = vmul.f32 -1.442695, %v392_v31 }
 0x696   :  { %2151 = vpow2.f32 %v1814_v32 }
 0x6a0   :  { %v2152_v33 = vpop.eup %2151 }
 0x6a1   :  { %v396_v34 = vadd.f32 1.0, %v2152_v33 }
 0x6a3   :  { %2153 = vrcp.f32 %v396_v34 }
 0x6ad   :  { %v2154_v35 = vpop.eup %2153 }
 0x6ae   :  { %v399_v36 = vmul.f32 2.0, %v2154_v35 }
 0x6b0   :  { %v1815_v37 = vadd.f32 -1.0, %v399_v36 }
 0x6b2   :  { %v401_v15 = vsel %vm2379_vm4, %v1815_v37, %v2154_v35 }
 0x6b3   :  { %404 = vrot.lane.b32.xlu0 %v401_v15, %s2262_s11  ;;  %v402_v40 = vmul.f32 %v401_v15, %v328_v0 }
 0x725   :  { %v405_v38 = vpop.permute.xlu0 %404 }
 0x726   :  { %v407_v39 = vmul.f32 %v405_v38, %v401_v15 }
 0x728   :  { %409 = vrot.lane.b32.xlu1 %v407_v39, %s2263_s12 }
 0x79a   :  { %v410_v41 = vpop.permute.xlu1 %409 }
 0x79b   :  { %v412_v43 = vadd.f32 %v410_v41, %v402_v40 }
 0x79d   :  { %2155 = vtanh.f32 %v412_v43 }
 0x7a7   :  { %v2156_v44 = vpop.eup %2155 }
 0x7a8   :  { %415 = vrot.lane.b32.xlu0 %v2156_v44, %s2262_s11 }
 0x81a   :  { %v416_v45 = vpop.permute.xlu0 %415 }
 0x81b   :  { %v2455_v46 = vmul.f32 %v416_v45, %v401_v15 }
 0x81d   :  { %v427_v47 = vpack.c.bf16 %v2455_v46, %v2455_v46 }
 0x81f   :  { %429 = vrot.lane.b32.xlu1 %v427_v47, %s2263_s12  ;;  %v144_v47 = vadd.f32 %v2372_v14, %v2437_v21 }
 0x891   :  { %v430_v48 = vpop.permute.xlu1 %429 }
 0x892   :  { %1990 = vmatmul.mubr.msk.bf16.vlgmr.msra.gmra.mrb[8].mxu1 %vm77_vm0, %v430_v48 }
 0x893   :  { %2002 = vmatpush3.bf16.msra.mxu1 %v2327_v2  ;;  %2005 = vmatprep.mubr.msk.bf16.mxu1 %vm2260_vm1, %v2259_v1 }
 0x894   :  { %2003 = vmatprep.subr.bf16.mxu1 %v2259_v1 }
 0x897   :  { %2004 = vmatpush3.bf16.msra.mxu1 %v2336_v4 }
 0x898   :  { %2017 = vmatprep.subr.bf16.mxu1 %v2259_v1 }
 0x965   :  { %v468_v50 = vpop.f32.mrb[8].mxu1 }
 0x966   :  { %v474_v51 = vadd.f32 %v468_v50, %v136_v49  ;;  %v1991_v52 = vpop.f32.mrb[9].mxu1 }
 0x967   :  { %v471_v53 = vpop.f32.mrb[10].mxu1 }
 0x968   :  { %v475_v54 = vmul.f32 2.0, %v474_v51  ;;  %v1992_v55 = vpop.f32.mrb[11].mxu1 }
 0x96a   :  { %v476_v56 = vsel %vm2379_vm4, %v475_v54, %v474_v51 }
 0x96b   :  { %v1817_v57 = vmul.f32 -1.442695, %v476_v56 }
 0x96d   :  { %2157 = vpow2.f32 %v1817_v57 }
 0x977   :  { %v2158_v58 = vpop.eup %2157 }
 0x978   :  { %v480_v59 = vadd.f32 1.0, %v2158_v58 }
 0x97a   :  { %2159 = vrcp.f32 %v480_v59 }
 0x984   :  { %v2160_v60 = vpop.eup %2159 }
 0x985   :  { %v483_v61 = vmul.f32 2.0, %v2160_v60 }
 0x987   :  { %v1818_v62 = vadd.f32 -1.0, %v483_v61 }
 0x989   :  { %v485_v20 = vsel %vm2379_vm4, %v1818_v62, %v2160_v60 }
 0x98a   :  { %488 = vrot.lane.b32.xlu0 %v485_v20, %s2262_s11  ;;  %v486_v3 = vmul.f32 %v485_v20, %v412_v43 }
 0x9fc   :  { %v489_v63 = vpop.permute.xlu0 %488 }
 0x9fd   :  { %v491_v0 = vmul.f32 %v489_v63, %v485_v20 }
 0x9ff   :  { %493 = vrot.lane.b32.xlu1 %v491_v0, %s2263_s12 }
 0xa71   :  { %v494_v5 = vpop.permute.xlu1 %493 }
 0xa72   :  { %v496_v6 = vadd.f32 %v494_v5, %v486_v3 }
 0xa74   :  { %2161 = vtanh.f32 %v496_v6 }
 0xa7e   :  { %v2162_v7 = vpop.eup %2161 }
 0xa7f   :  { %499 = vrot.lane.b32.xlu0 %v2162_v7, %s2262_s11  ;;  %v149_v7 = vadd.f32 %v2431_v17, %v2372_v14 }
 0xaf1   :  { %v500_v8 = vpop.permute.xlu0 %499 }
 0xaf2   :  { %v2476_v9 = vmul.f32 %v500_v8, %v485_v20 }
 0xaf4   :  { %v511_v10 = vpack.c.bf16 %v2476_v9, %v2476_v9 }
 0xaf6   :  { %513 = vrot.lane.b32.xlu1 %v511_v10, %s2263_s12 }
 0xb68   :  { %v514_v12 = vpop.permute.xlu1 %513 }
 0xb69   :  { %1998 = vmatmul.mubr.msk.bf16.vlgmr.msra.gmra.mrb[12].mxu0 %vm77_vm0, %v514_v12 }
 0xb6a   :  { %2010 = vmatpush3.bf16.msra.mxu0 %v2327_v2  ;;  %2013 = vmatprep.mubr.msk.bf16.mxu0 %vm2260_vm1, %v2259_v1 }
 0xb6b   :  { %2011 = vmatprep.subr.bf16.mxu0 %v2259_v1 }
 0xb6e   :  { %2012 = vmatpush3.bf16.msra.mxu0 %v2336_v4 }
 0xc3c   :  { %v552_v22 = vpop.f32.mrb[12].mxu0 }
 0xc3d   :  { %v558_v23 = vadd.f32 %v552_v22, %v141_v16  ;;  %v1999_v24 = vpop.f32.mrb[13].mxu0 }
 0xc3e   :  { %v555_v26 = vpop.f32.mrb[14].mxu0 }
 0xc3f   :  { %v559_v27 = vmul.f32 2.0, %v558_v23  ;;  %v2000_v28 = vpop.f32.mrb[15].mxu0 }
 0xc41   :  { %v560_v29 = vsel %vm2379_vm4, %v559_v27, %v558_v23 }
 0xc42   :  { %v1820_v30 = vmul.f32 -1.442695, %v560_v29 }
 0xc44   :  { %2163 = vpow2.f32 %v1820_v30 }
 0xc4e   :  { %v2164_v31 = vpop.eup %2163 }
 0xc4f   :  { %v564_v32 = vadd.f32 1.0, %v2164_v31 }
 0xc51   :  { %2165 = vrcp.f32 %v564_v32 }
 0xc5b   :  { %v2166_v33 = vpop.eup %2165 }
 0xc5c   :  { %v567_v34 = vmul.f32 2.0, %v2166_v33 }
 0xc5e   :  { %v1821_v35 = vadd.f32 -1.0, %v567_v34 }
 0xc60   :  { %v569_v18 = vsel %vm2379_vm4, %v1821_v35, %v2166_v33 }
 0xc61   :  { %572 = vrot.lane.b32.xlu0 %v569_v18, %s2262_s11  ;;  %v570_v15 = vmul.f32 %v569_v18, %v496_v6 }
 0xcd3   :  { %v573_v36 = vpop.permute.xlu0 %572 }
 0xcd4   :  { %v575_v37 = vmul.f32 %v573_v36, %v569_v18 }
 0xcd6   :  { %577 = vrot.lane.b32.xlu1 %v575_v37, %s2263_s12 }
 0xd48   :  { %v578_v38 = vpop.permute.xlu1 %577 }
 0xd49   :  { %v580_v39 = vadd.f32 %v578_v38, %v570_v15  ;;  %v2131_v15 = vld [vmem:[%s2792_s1 + $0x10] sm:$0xff]  }
 0xd4a   :  { %2025 = vmatprep.subr.bf16.mxu0 %v2131_v15 }
 0xd4b   :  { %2167 = vtanh.f32 %v580_v39 }
 0xd55   :  { %v2168_v40 = vpop.eup %2167 }
 0xd56   :  { %583 = vrot.lane.b32.xlu0 %v2168_v40, %s2262_s11 }
 0xdc8   :  { %v584_v41 = vpop.permute.xlu0 %583 }
 0xdc9   :  { %v2496_v43 = vmul.f32 %v584_v41, %v569_v18 }
 0xdcb   :  { %v595_v44 = vpack.c.bf16 %v2496_v43, %v2496_v43 }
 0xdcd   :  { %597 = vrot.lane.b32.xlu1 %v595_v44, %s2263_s12 }
 0xe3f   :  { %v598_v45 = vpop.permute.xlu1 %597 }
 0xe40   :  { %2006 = vmatmul.mubr.msk.bf16.vlgmr.msra.gmra.mrb[12].mxu1 %vm77_vm0, %v598_v45 }
 0xe41   :  { %2018 = vmatpush3.bf16.msra.mxu1 %v2327_v2  ;;  %2021 = vmatprep.mubr.msk.bf16.mxu1 %vm2260_vm1, %v2259_v1 }
 0xe42   :  { %2019 = vmatprep.subr.bf16.mxu1 %v2259_v1 }
 0xe45   :  { %2020 = vmatpush3.bf16.msra.mxu1 %v2336_v4 }
 0xe46   :  { %2037 = vmatprep.subr.bf16.mxu1 %v2259_v1 }
 0xf13   :  { %v636_v48 = vpop.f32.mrb[12].mxu1 }
 0xf14   :  { %v642_v49 = vadd.f32 %v636_v48, %v144_v47  ;;  %v2007_v50 = vpop.f32.mrb[13].mxu1 }
 0xf15   :  { %v639_v51 = vpop.f32.mrb[14].mxu1  ;;  %v2563_v50 = vld [vmem:[%s2793_s2 + $0x10] sm:$0xff]  }
 0xf16   :  { %v643_v52 = vmul.f32 2.0, %v642_v49  ;;  %v2008_v53 = vpop.f32.mrb[15].mxu1  ;;  %v2571_v51 = vld [vmem:[%s2793_s2 + $0x18] sm:$0xff]  }
 0xf18   :  { %v644_v2 = vsel %vm2379_vm4, %v643_v52, %v642_v49 }
 0xf19   :  { %v1823_v54 = vmul.f32 -1.442695, %v644_v2 }
 0xf1b   :  { %2169 = vpow2.f32 %v1823_v54 }
 0xf25   :  { %v2170_v55 = vpop.eup %2169 }
 0xf26   :  { %v648_v56 = vadd.f32 1.0, %v2170_v55 }
 0xf28   :  { %2171 = vrcp.f32 %v648_v56 }
 0xf32   :  { %v2172_v4 = vpop.eup %2171 }
 0xf33   :  { %v651_v57 = vmul.f32 2.0, %v2172_v4 }
 0xf35   :  { %v1824_v58 = vadd.f32 -1.0, %v651_v57 }
 0xf37   :  { %v653_v21 = vsel %vm2379_vm4, %v1824_v58, %v2172_v4 }
 0xf38   :  { %656 = vrot.lane.b32.xlu0 %v653_v21, %s2262_s11  ;;  %v654_v61 = vmul.f32 %v653_v21, %v580_v39 }
 0xfaa   :  { %v657_v59 = vpop.permute.xlu0 %656 }
 0xfab   :  { %v659_v60 = vmul.f32 %v657_v59, %v653_v21  ;;  %v2600_v59 = vld [vmem:[%s2794_s3 + $0x1] ss:$0 sm:$0xff] }
 0xfad   :  { %661 = vrot.lane.b32.xlu1 %v659_v60, %s2263_s12 }
0x101f   :  { %v662_v62 = vpop.permute.xlu1 %661 }
0x1020   :  { %v664_v20 = vadd.f32 %v662_v62, %v654_v61 }
0x1022   :  { %2173 = vtanh.f32 %v664_v20 }
0x102c   :  { %v2174_v63 = vpop.eup %2173 }
0x102d   :  { %667 = vrot.lane.b32.xlu0 %v2174_v63, %s2262_s11 }
0x109f   :  { %v668_v0 = vpop.permute.xlu0 %667 }
0x10a0   :  { %v2517_v3 = vmul.f32 %v668_v0, %v653_v21 }
0x10a2   :  { %v679_v5 = vpack.c.bf16 %v2517_v3, %v2517_v3 }
0x10a4   :  { %681 = vrot.lane.b32.xlu1 %v679_v5, %s2263_s12 }
0x1116   :  { %v682_v6 = vpop.permute.xlu1 %681 }
0x1117   :  { %2014 = vmatmul.mubr.msk.bf16.vlgmr.msra.gmra.mrb[16].mxu0 %vm77_vm0, %v682_v6 }
0x1118   :  { %2026 = vmatpush3.bf16.msra.mxu0 %v2131_v15 }
0x11ea   :  { %v720_v8 = vpop.f32.mrb[16].mxu0 }
0x11eb   :  { %v726_v10 = vadd.f32 %v720_v8, %v149_v7  ;;  %v2015_v12 = vpop.f32.mrb[17].mxu0 }
0x11ec   :  { %v723_v16 = vpop.f32.mrb[18].mxu0 }
0x11ed   :  { %v727_v22 = vmul.f32 2.0, %v726_v10  ;;  %v2016_v23 = vpop.f32.mrb[19].mxu0 }
0x11ef   :  { %v728_v24 = vsel %vm2379_vm4, %v727_v22, %v726_v10 }
0x11f0   :  { %v1826_v26 = vmul.f32 -1.442695, %v728_v24 }
0x11f2   :  { %2175 = vpow2.f32 %v1826_v26 }
0x11fc   :  { %v2176_v27 = vpop.eup %2175 }
0x11fd   :  { %v732_v28 = vadd.f32 1.0, %v2176_v27 }
0x11ff   :  { %2177 = vrcp.f32 %v732_v28 }
0x1209   :  { %v2178_v29 = vpop.eup %2177 }
0x120a   :  { %v735_v30 = vmul.f32 2.0, %v2178_v29 }
0x120c   :  { %v1827_v31 = vadd.f32 -1.0, %v735_v30 }
0x120e   :  { %v737_v17 = vsel %vm2379_vm4, %v1827_v31, %v2178_v29 }
0x120f   :  { %740 = vrot.lane.b32.xlu0 %v737_v17, %s2262_s11  ;;  %v738_v34 = vmul.f32 %v737_v17, %v664_v20 }
0x1281   :  { %v741_v32 = vpop.permute.xlu0 %740 }
0x1282   :  { %v743_v33 = vmul.f32 %v741_v32, %v737_v17 }
0x1284   :  { %745 = vrot.lane.b32.xlu1 %v743_v33, %s2263_s12 }
0x1288   :  { %253 = vrot.lane.b32.xlu1 %v2390_v42, %s2263_s12  ;;  %v2132_v42 = vld [vmem:[%s2792_s1 + $0x18] sm:$0xff]  }
0x1289   :  { %2027 = vmatprep.subr.bf16.mxu0 %v2132_v42 }
0x128a   :  { %2028 = vmatpush3.bf16.msra.mxu0 %v2132_v42 }
0x128b   :  { %2053 = vmatprep.subr.bf16.mxu0 %v2259_v1 }
0x128c   :  { %420 = vrot.lane.b32.xlu1 %v2455_v46, %s2263_s12 }
0x12f6   :  { %v746_v35 = vpop.permute.xlu1 %745 }
0x12f7   :  { %v2535_v18 = vadd.f32 %v746_v35, %v738_v34 }
0x12f9   :  { %2179 = vtanh.f32 %v2535_v18 }
0x12fa   :  { %v254_v36 = vpop.permute.xlu1 %253 }
0x12fb   :  { %256 = vst.msk [vmem:[#allocation2] sm:$0xff] %vm77_vm0, %v254_v36 }
0x12fe   :  { %v421_v37 = vpop.permute.xlu1 %420 }
0x12ff   :  { %424 = vst.msk [vmem:[#allocation2 + $0x10] sm:$0xff] %vm77_vm0, %v421_v37 }
0x1302   :  { %v845_v45 = vld [vmem:[#allocation2] sm:$0xff] }
0x1303   :  { %v2180_v46 = vpop.eup %2179 }
0x1304   :  { %751 = vrot.lane.b32.xlu0 %v2180_v46, %s2262_s11 }
0x1308   :  { %336 = vrot.lane.b32.xlu0 %v2426_v13, %s2263_s12 }
0x130c   :  { %504 = vrot.lane.b32.xlu0 %v2476_v9, %s2263_s12  ;;  %v847_v9 = vld [vmem:[#allocation2 + $0x10] sm:$0xff] }
0x1376   :  { %v752_v38 = vpop.permute.xlu0 %751 }
0x1377   :  { %v2552_v39 = vmul.f32 %v752_v38, %v737_v17 }
0x1379   :  { %v763_v40 = vpack.c.bf16 %v2552_v39, %v2552_v39 }
0x137a   :  { %v337_v41 = vpop.permute.xlu0 %336 }
0x137b   :  { %340 = vst.msk [vmem:[#allocation2 + $0x8] sm:$0xff] %vm77_vm0, %v337_v41  ;;  %765 = vrot.lane.b32.xlu1 %v763_v40, %s2263_s12 }
0x137e   :  { %v505_v44 = vpop.permute.xlu0 %504 }
0x137f   :  { %508 = vst.msk [vmem:[#allocation2 + $0x18] sm:$0xff] %vm77_vm0, %v505_v44 }
0x1382   :  { %v846_v47 = vld [vmem:[#allocation2 + $0x8] sm:$0xff] }
0x1383   :  { %v853_v13 = vpack.c.bf16 %v846_v47, %v845_v45 }
0x1385   :  { %2029 = vmatprep.mubr.msk.bf16.mxu0 %vm77_vm0, %v853_v13 }
0x1386   :  { %v848_v48 = vld [vmem:[#allocation2 + $0x18] sm:$0xff] }
0x1387   :  { %v854_v49 = vpack.c.bf16 %v848_v48, %v847_v9 }
0x1389   :  { %2030 = vmatmul.mubr.msk.bf16.vlgmr.msra.gmra.mrb[20].mxu0 %vm77_vm0, %v854_v49 }
0x138a   :  { %2054 = vmatpush3.bf16.msra.mxu0 %v2563_v50 }
0x138b   :  { %2055 = vmatprep.subr.bf16.mxu0 %v2259_v1 }
0x138e   :  { %2056 = vmatpush3.bf16.msra.mxu0 %v2571_v51 }
0x138f   :  { %2069 = vmatprep.subr.bf16.mxu0 %v2259_v1 }
0x13ed   :  { %v766_v52 = vpop.permute.xlu1 %765 }
0x13ee   :  { %2022 = vmatmul.mubr.msk.bf16.vlgmr.msra.gmra.mrb[16].mxu1 %vm77_vm0, %v766_v52 }
0x13ef   :  { %2038 = vmatpush3.bf16.msra.mxu1 %v2563_v50  ;;  %2041 = vmatprep.mubr.msk.bf16.mxu1 %vm2260_vm1, %v2259_v1 }
0x13f0   :  { %2039 = vmatprep.subr.bf16.mxu1 %v2259_v1 }
0x13f3   :  { %2040 = vmatpush3.bf16.msra.mxu1 %v2571_v51 }
0x13f4   :  { %2045 = vmatprep.subr.bf16.mxu1 %v2259_v1 }
0x13f6   :  { %2042 = vmatmul.mubr.bf16.vlgmr.msra.gmra.mrb[20].mxu1 %v2261_v11  ;;  %v152_v11 = vadd.f32 %v2435_v19, %v2372_v14 }
0x13f7   :  { %2046 = vmatpush3.bf16.msra.mxu1 %v2563_v50  ;;  %2049 = vmatprep.mubr.msk.bf16.mxu1 %vm2260_vm1, %v2259_v1 }
0x13f8   :  { %2047 = vmatprep.subr.bf16.mxu1 %v2259_v1 }
0x13fb   :  { %2048 = vmatpush3.bf16.msra.mxu1 %v2571_v51 }
0x13fc   :  { %2061 = vmatprep.subr.bf16.mxu1 %v2259_v1 }
0x145c   :  { %v2589_v53 = vpop.f32.mrb[20].mxu0 }
0x145d   :  { %v928_v2 = vpop.f32.mrb[21].mxu0 }
0x145e   :  { %v2591_v54 = vpop.f32.mrb[22].mxu0  ;;  %v929_v60 = vadd.f32 %v2600_v59, %v928_v2 }
0x145f   :  { %v2593_v55 = vpop.f32.mrb[23].mxu0 }
0x1460   :  { %v932_v48 = vadd.f32 %v2600_v59, %v2593_v55 }
0x14c1   :  { %v804_v56 = vpop.f32.mrb[16].mxu1 }
0x14c2   :  { %v810_v4 = vadd.f32 %v804_v56, %v152_v11  ;;  %v2023_v57 = vpop.f32.mrb[17].mxu1 }
0x14c3   :  { %v807_v58 = vpop.f32.mrb[18].mxu1 }
0x14c4   :  { %v2024_v21 = vpop.f32.mrb[19].mxu1  ;;  %v811_v24 = vmul.f32 2.0, %v810_v4 }
0x14c6   :  { %v812_v26 = vsel %vm2379_vm4, %v811_v24, %v810_v4 }
0x14c7   :  { %v1829_v27 = vmul.f32 -1.442695, %v812_v26 }
0x14c9   :  { %v1019_v61 = vpop.f32.mrb[20].mxu1 }
0x14ca   :  { %v1025_v62 = vadd.f32 %v1019_v61, %v929_v60  ;;  %v2043_v20 = vpop.f32.mrb[21].mxu1 }
0x14cb   :  { %v1022_v63 = vpop.f32.mrb[22].mxu1 }
0x14cc   :  { %v1026_v0 = vmul.f32 2.0, %v1025_v62  ;;  %v2044_v5 = vpop.f32.mrb[23].mxu1 }
0x14ce   :  { %v1027_v14 = vsel %vm2379_vm4, %v1026_v0, %v1025_v62 }
0x14cf   :  { %v1849_v19 = vmul.f32 -1.442695, %v1027_v14 }
0x14d1   :  { %2181 = vpow2.f32 %v1849_v19 }
0x14db   :  { %v2182_v6 = vpop.eup %2181 }
0x14dc   :  { %v1031_v7 = vadd.f32 1.0, %v2182_v6 }
0x14de   :  { %2183 = vrcp.f32 %v1031_v7 }
0x14df   :  { %2185 = vpow2.f32 %v1829_v27 }
0x14e8   :  { %v2184_v8 = vpop.eup %2183 }
0x14e9   :  { %v1034_v10 = vmul.f32 2.0, %v2184_v8  ;;  %v2186_v28 = vpop.eup %2185 }
0x14ea   :  { %v816_v29 = vadd.f32 1.0, %v2186_v28 }
0x14eb   :  { %v1850_v12 = vadd.f32 -1.0, %v1034_v10 }
0x14ec   :  { %2187 = vrcp.f32 %v816_v29 }
0x14ed   :  { %v1036_v16 = vsel %vm2379_vm4, %v1850_v12, %v2184_v8 }
0x14ee   :  { %1039 = vrot.lane.b32.xlu0 %v1036_v16, %s2262_s11  ;;  %v1037_v30 = vmul.f32 0.0, %v1036_v16 }
0x14f6   :  { %v2188_v32 = vpop.eup %2187 }
0x14f7   :  { %v819_v33 = vmul.f32 2.0, %v2188_v32 }
0x14f9   :  { %v1830_v35 = vadd.f32 -1.0, %v819_v33 }
0x14fb   :  { %v821_v36 = vsel %vm2379_vm4, %v1830_v35, %v2188_v32 }
0x14fc   :  { %v822_v41 = vmul.f32 %v821_v36, %v2535_v18 }
0x1560   :  { %v1040_v22 = vpop.permute.xlu0 %1039 }
0x1561   :  { %v1042_v23 = vmul.f32 %v1040_v22, %v1036_v16 }
0x1563   :  { %1044 = vrot.lane.b32.xlu1 %v1042_v23, %s2263_s12 }
0x15d5   :  { %v1045_v31 = vpop.permute.xlu1 %1044 }
0x15d6   :  { %v1047_v17 = vadd.f32 %v1045_v31, %v1037_v30 }
0x15d8   :  { %2189 = vtanh.f32 %v1047_v17 }
0x15e2   :  { %v2190_v34 = vpop.eup %2189 }
0x15e3   :  { %1050 = vrot.lane.b32.xlu0 %v2190_v34, %s2262_s11 }
0x15e7   :  { %824 = vrot.lane.b32.xlu0 %v821_v36, %s2262_s11 }
0x1655   :  { %v1051_v37 = vpop.permute.xlu0 %1050 }
0x1656   :  { %v1053_v15 = vmul.f32 %v1051_v37, %v1036_v16 }
0x1658   :  { %v1055_v42 = vpack.c.bf16 %v1053_v15, %v1053_v15 }
0x1659   :  { %v825_v46 = vpop.permute.xlu0 %824 }
0x165a   :  { %v827_v38 = vmul.f32 %v825_v46, %v821_v36  ;;  %1057 = vrot.lane.b32.xlu1 %v1055_v42, %s2263_s12 }
0x165c   :  { %829 = vrot.lane.b32.xlu0 %v827_v38, %s2263_s12 }
0x16cc   :  { %v1058_v40 = vpop.permute.xlu1 %1057 }
0x16cd   :  { %2050 = vmatmul.mubr.msk.bf16.vlgmr.msra.gmra.mrb[24].mxu1 %vm77_vm0, %v1058_v40 }
0x16ce   :  { %v830_v44 = vpop.permute.xlu0 %829  ;;  %2062 = vmatpush3.bf16.msra.mxu1 %v2563_v50  ;;  %2065 = vmatprep.mubr.msk.bf16.mxu1 %vm2260_vm1, %v2259_v1 }
0x16cf   :  { %v832_v45 = vadd.f32 %v830_v44, %v822_v41  ;;  %2063 = vmatprep.subr.bf16.mxu1 %v2259_v1 }
0x16d1   :  { %2191 = vtanh.f32 %v832_v45 }
0x16d2   :  { %2064 = vmatpush3.bf16.msra.mxu1 %v2571_v51 }
0x16d3   :  { %2077 = vmatprep.subr.bf16.mxu1 %v2259_v1 }
0x16db   :  { %v2192_v47 = vpop.eup %2191 }
0x16dc   :  { %835 = vrot.lane.b32.xlu0 %v2192_v47, %s2262_s11 }
0x16e0   :  { %588 = vrot.lane.b32.xlu0 %v2496_v43, %s2263_s12 }
0x16e4   :  { %756 = vrot.lane.b32.xlu0 %v2552_v39, %s2263_s12 }
0x174e   :  { %v836_v18 = vpop.permute.xlu0 %835 }
0x174f   :  { %v838_v19 = vmul.f32 %v836_v18, %v821_v36 }
0x1752   :  { %v589_v13 = vpop.permute.xlu0 %588 }
0x1753   :  { %592 = vst.msk [vmem:[#allocation2 + $0x20] sm:$0xff] %vm77_vm0, %v589_v13 }
0x1756   :  { %v757_v9 = vpop.permute.xlu0 %756 }
0x1757   :  { %760 = vst.msk [vmem:[#allocation2 + $0x30] sm:$0xff] %vm77_vm0, %v757_v9 }
0x175a   :  { %v849_v16 = vld [vmem:[#allocation2 + $0x20] sm:$0xff] }
0x17a0   :  { %v1096_v49 = vpop.f32.mrb[24].mxu1 }
0x17a1   :  { %v1102_v52 = vadd.f32 %v1096_v49, %v932_v48  ;;  %v2051_v2 = vpop.f32.mrb[25].mxu1 }
0x17a2   :  { %v1099_v11 = vpop.f32.mrb[26].mxu1 }
0x17a3   :  { %v1103_v56 = vmul.f32 2.0, %v1102_v52  ;;  %v2052_v4 = vpop.f32.mrb[27].mxu1 }
0x17a5   :  { %v1104_v43 = vsel %vm2379_vm4, %v1103_v56, %v1102_v52  ;;  %v940_v56 = vadd.f32 %v2591_v54, %v2600_v59 }
0x17a6   :  { %v1852_v39 = vmul.f32 -1.442695, %v1104_v43 }
0x17a8   :  { %2193 = vpow2.f32 %v1852_v39 }
0x17b2   :  { %v2194_v57 = vpop.eup %2193 }
0x17b3   :  { %v1108_v58 = vadd.f32 1.0, %v2194_v57 }
0x17b5   :  { %2195 = vrcp.f32 %v1108_v58 }
0x17bf   :  { %v2196_v21 = vpop.eup %2195 }
0x17c0   :  { %v1111_v60 = vmul.f32 2.0, %v2196_v21 }
0x17c2   :  { %v1853_v61 = vadd.f32 -1.0, %v1111_v60 }
0x17c4   :  { %v1113_v55 = vsel %vm2379_vm4, %v1853_v61, %v2196_v21 }
0x17c5   :  { %1116 = vrot.lane.b32.xlu1 %v1113_v55, %s2262_s11  ;;  %v1114_v63 = vmul.f32 %v1113_v55, %v1047_v17  ;;  %v937_v17 = vadd.f32 %v2589_v53, %v2600_v59 }
0x1837   :  { %v1117_v62 = vpop.permute.xlu1 %1116 }
0x1838   :  { %v1119_v20 = vmul.f32 %v1117_v62, %v1113_v55 }
0x183a   :  { %1121 = vrot.lane.b32.xlu1 %v1119_v20, %s2263_s12 }
0x18ac   :  { %v1122_v0 = vpop.permute.xlu1 %1121 }
0x18ad   :  { %v1124_v5 = vadd.f32 %v1122_v0, %v1114_v63 }
0x18af   :  { %2197 = vtanh.f32 %v1124_v5 }
0x18b9   :  { %v2198_v14 = vpop.eup %2197 }
0x18ba   :  { %1127 = vrot.lane.b32.xlu1 %v2198_v14, %s2262_s11 }
0x18be   :  { %672 = vrot.lane.b32.xlu1 %v2517_v3, %s2263_s12  ;;  %v851_v3 = vld [vmem:[#allocation2 + $0x30] sm:$0xff] }
0x18c2   :  { %840 = vrot.lane.b32.xlu1 %v838_v19, %s2263_s12 }
0x192c   :  { %v1128_v6 = vpop.permute.xlu1 %1127 }
0x192d   :  { %v1130_v7 = vmul.f32 %v1128_v6, %v1113_v55 }
0x192f   :  { %v1132_v8 = vpack.c.bf16 %v1130_v7, %v1130_v7 }
0x1930   :  { %v673_v10 = vpop.permute.xlu1 %672 }
0x1931   :  { %676 = vst.msk [vmem:[#allocation2 + $0x28] sm:$0xff] %vm77_vm0, %v673_v10  ;;  %1134 = vrot.lane.b32.xlu0 %v1132_v8, %s2263_s12 }
0x1934   :  { %v841_v12 = vpop.permute.xlu1 %840 }
0x1935   :  { %844 = vst.msk [vmem:[#allocation2 + $0x38] sm:$0xff] %vm77_vm0, %v841_v12 }
0x1938   :  { %v850_v22 = vld [vmem:[#allocation2 + $0x28] sm:$0xff] }
0x1939   :  { %v855_v23 = vpack.c.bf16 %v850_v22, %v849_v16 }
0x193b   :  { %2033 = vmatprep.mubr.msk.bf16.mxu0 %vm77_vm0, %v855_v23 }
0x193c   :  { %v852_v24 = vld [vmem:[#allocation2 + $0x38] sm:$0xff] }
0x193d   :  { %v856_v26 = vpack.c.bf16 %v852_v24, %v851_v3 }
0x193f   :  { %2034 = vmatmul.mubr.msk.bf16.gmra.mrb[24].mxu0 %vm77_vm0, %v856_v26 }
0x1940   :  { %2057 = vmatprep.mubr.msk.bf16.mxu0 %vm2260_vm1, %v2259_v1 }
0x19a3   :  { %v1135_v27 = vpop.permute.xlu0 %1134 }
0x19a4   :  { %2058 = vmatmul.mubr.msk.bf16.vlgmr.msra.gmra.mrb[28].mxu0 %vm77_vm0, %v1135_v27 }
0x19a5   :  { %2070 = vmatpush3.bf16.msra.mxu0 %v2563_v50  ;;  %2073 = vmatprep.mubr.msk.bf16.mxu0 %vm2260_vm1, %v2259_v1 }
0x19a6   :  { %2071 = vmatprep.subr.bf16.mxu0 %v2259_v1 }
0x19a9   :  { %2072 = vmatpush3.bf16.msra.mxu0 %v2571_v51 }
0x19aa   :  { %2085 = vmatprep.subr.bf16.mxu0 %v2259_v1 }
0x1a12   :  { %v2658_v28 = vpop.f32.mrb[24].mxu0 }
0x1a13   :  { %v2660_v29 = vpop.f32.mrb[25].mxu0 }
0x1a14   :  { %v2662_v30 = vpop.f32.mrb[26].mxu0  ;;  %v945_v23 = vadd.f32 %v2600_v59, %v2660_v29 }
0x1a15   :  { %v2664_v31 = vpop.f32.mrb[27].mxu0 }
0x1a77   :  { %v1173_v32 = vpop.f32.mrb[28].mxu0 }
0x1a78   :  { %v1179_v33 = vadd.f32 %v1173_v32, %v937_v17  ;;  %v2059_v34 = vpop.f32.mrb[29].mxu0 }
0x1a79   :  { %v1176_v35 = vpop.f32.mrb[30].mxu0 }
0x1a7a   :  { %v1180_v36 = vmul.f32 2.0, %v1179_v33  ;;  %v2060_v37 = vpop.f32.mrb[31].mxu0 }
0x1a7c   :  { %v1181_v15 = vsel %vm2379_vm4, %v1180_v36, %v1179_v33 }
0x1a7d   :  { %v1855_v42 = vmul.f32 -1.442695, %v1181_v15 }
0x1a7f   :  { %2199 = vpow2.f32 %v1855_v42 }
0x1a89   :  { %v2200_v46 = vpop.eup %2199 }
0x1a8a   :  { %v1185_v38 = vadd.f32 1.0, %v2200_v46 }
0x1a8c   :  { %2201 = vrcp.f32 %v1185_v38 }
0x1a96   :  { %v2202_v40 = vpop.eup %2201 }
0x1a97   :  { %v1188_v41 = vmul.f32 2.0, %v2202_v40 }
0x1a99   :  { %v1856_v44 = vadd.f32 -1.0, %v1188_v41 }
0x1a9b   :  { %v1190_v53 = vsel %vm2379_vm4, %v1856_v44, %v2202_v40 }
0x1a9c   :  { %1193 = vrot.lane.b32.xlu1 %v1190_v53, %s2262_s11  ;;  %v1191_v18 = vmul.f32 %v1190_v53, %v1124_v5 }
0x1b0e   :  { %v1194_v45 = vpop.permute.xlu1 %1193 }
0x1b0f   :  { %v1196_v47 = vmul.f32 %v1194_v45, %v1190_v53 }
0x1b11   :  { %1198 = vrot.lane.b32.xlu0 %v1196_v47, %s2263_s12 }
0x1b83   :  { %v1199_v13 = vpop.permute.xlu0 %1198 }
0x1b84   :  { %v1201_v9 = vadd.f32 %v1199_v13, %v1191_v18 }
0x1b86   :  { %2203 = vtanh.f32 %v1201_v9 }
0x1b90   :  { %v2204_v48 = vpop.eup %2203 }
0x1b91   :  { %1204 = vrot.lane.b32.xlu1 %v2204_v48, %s2262_s11 }
0x1c03   :  { %v1205_v49 = vpop.permute.xlu1 %1204 }
0x1c04   :  { %v1207_v52 = vmul.f32 %v1205_v49, %v1190_v53 }
0x1c06   :  { %v1209_v2 = vpack.c.bf16 %v1207_v52, %v1207_v52 }
0x1c08   :  { %1211 = vrot.lane.b32.xlu0 %v1209_v2, %s2263_s12 }
0x1c7a   :  { %v1212_v11 = vpop.permute.xlu0 %1211 }
0x1c7b   :  { %2066 = vmatmul.mubr.msk.bf16.vlgmr.msra.gmra.mrb[28].mxu1 %vm77_vm0, %v1212_v11 }
0x1c7c   :  { %2078 = vmatpush3.bf16.msra.mxu1 %v2563_v50  ;;  %2081 = vmatprep.mubr.msk.bf16.mxu1 %vm2260_vm1, %v2259_v1 }
0x1c7d   :  { %2079 = vmatprep.subr.bf16.mxu1 %v2259_v1 }
0x1c80   :  { %2080 = vmatpush3.bf16.msra.mxu1 %v2571_v51 }
0x1c81   :  { %2093 = vmatprep.subr.bf16.mxu1 %v2259_v1 }
0x1d4e   :  { %v1250_v4 = vpop.f32.mrb[28].mxu1 }
0x1d4f   :  { %v1256_v43 = vadd.f32 %v1250_v4, %v940_v56  ;;  %v2067_v39 = vpop.f32.mrb[29].mxu1 }
0x1d50   :  { %v1253_v57 = vpop.f32.mrb[30].mxu1 }
0x1d51   :  { %v1257_v58 = vmul.f32 2.0, %v1256_v43  ;;  %v2068_v21 = vpop.f32.mrb[31].mxu1 }
0x1d53   :  { %v1258_v60 = vsel %vm2379_vm4, %v1257_v58, %v1256_v43 }
0x1d54   :  { %v1858_v61 = vmul.f32 -1.442695, %v1258_v60 }
0x1d56   :  { %2205 = vpow2.f32 %v1858_v61 }
0x1d60   :  { %v2206_v55 = vpop.eup %2205 }
0x1d61   :  { %v1262_v62 = vadd.f32 1.0, %v2206_v55 }
0x1d63   :  { %2207 = vrcp.f32 %v1262_v62 }
0x1d6d   :  { %v2208_v20 = vpop.eup %2207 }
0x1d6e   :  { %v1265_v63 = vmul.f32 2.0, %v2208_v20 }
0x1d70   :  { %v1859_v0 = vadd.f32 -1.0, %v1265_v63 }
0x1d72   :  { %v1267_v54 = vsel %vm2379_vm4, %v1859_v0, %v2208_v20 }
0x1d73   :  { %1270 = vrot.lane.b32.xlu1 %v1267_v54, %s2262_s11  ;;  %v1268_v19 = vmul.f32 %v1267_v54, %v1201_v9  ;;  %v948_v9 = vadd.f32 %v2600_v59, %v2664_v31 }
0x1de5   :  { %v1271_v5 = vpop.permute.xlu1 %1270 }
0x1de6   :  { %v1273_v14 = vmul.f32 %v1271_v5, %v1267_v54 }
0x1de8   :  { %1275 = vrot.lane.b32.xlu0 %v1273_v14, %s2263_s12  ;;  %v953_v14 = vadd.f32 %v2658_v28, %v2600_v59 }
0x1e5a   :  { %v1276_v6 = vpop.permute.xlu0 %1275 }
0x1e5b   :  { %v1278_v7 = vadd.f32 %v1276_v6, %v1268_v19 }
0x1e5d   :  { %2209 = vtanh.f32 %v1278_v7 }
0x1e67   :  { %v2210_v8 = vpop.eup %2209 }
0x1e68   :  { %1281 = vrot.lane.b32.xlu1 %v2210_v8, %s2262_s11 }
0x1eda   :  { %v1282_v10 = vpop.permute.xlu1 %1281 }
0x1edb   :  { %v1284_v12 = vmul.f32 %v1282_v10, %v1267_v54 }
0x1edd   :  { %v1286_v16 = vpack.c.bf16 %v1284_v12, %v1284_v12 }
0x1edf   :  { %1288 = vrot.lane.b32.xlu0 %v1286_v16, %s2263_s12 }
0x1f51   :  { %v1289_v22 = vpop.permute.xlu0 %1288 }
0x1f52   :  { %2074 = vmatmul.mubr.msk.bf16.vlgmr.msra.gmra.mrb[32].mxu0 %vm77_vm0, %v1289_v22 }
0x1f53   :  { %2086 = vmatpush3.bf16.msra.mxu0 %v2563_v50  ;;  %2089 = vmatprep.mubr.msk.bf16.mxu0 %vm2260_vm1, %v2259_v1 }
0x1f54   :  { %2087 = vmatprep.subr.bf16.mxu0 %v2259_v1 }
0x1f57   :  { %2088 = vmatpush3.bf16.msra.mxu0 %v2571_v51 }
0x1f58   :  { %2101 = vmatprep.subr.bf16.mxu0 %v2259_v1 }
0x2025   :  { %v1327_v3 = vpop.f32.mrb[32].mxu0 }
0x2026   :  { %v1333_v24 = vadd.f32 %v1327_v3, %v945_v23  ;;  %v2075_v26 = vpop.f32.mrb[33].mxu0 }
0x2027   :  { %v1330_v27 = vpop.f32.mrb[34].mxu0 }
0x2028   :  { %v1334_v17 = vmul.f32 2.0, %v1333_v24  ;;  %v2076_v32 = vpop.f32.mrb[35].mxu0 }
0x202a   :  { %v1335_v33 = vsel %vm2379_vm4, %v1334_v17, %v1333_v24 }
0x202b   :  { %v1861_v34 = vmul.f32 -1.442695, %v1335_v33 }
0x202d   :  { %2211 = vpow2.f32 %v1861_v34 }
0x2037   :  { %v2212_v35 = vpop.eup %2211 }
0x2038   :  { %v1339_v36 = vadd.f32 1.0, %v2212_v35 }
0x203a   :  { %2213 = vrcp.f32 %v1339_v36 }
0x2044   :  { %v2214_v37 = vpop.eup %2213 }
0x2045   :  { %v1342_v15 = vmul.f32 2.0, %v2214_v37 }
0x2047   :  { %v1862_v42 = vadd.f32 -1.0, %v1342_v15 }
0x2049   :  { %v1344_v29 = vsel %vm2379_vm4, %v1862_v42, %v2214_v37 }
0x204a   :  { %1347 = vrot.lane.b32.xlu1 %v1344_v29, %s2262_s11  ;;  %v1345_v40 = vmul.f32 %v1344_v29, %v1278_v7 }
0x20bc   :  { %v1348_v46 = vpop.permute.xlu1 %1347 }
0x20bd   :  { %v1350_v38 = vmul.f32 %v1348_v46, %v1344_v29  ;;  %v956_v46 = vadd.f32 %v2662_v30, %v2600_v59 }
0x20bf   :  { %1352 = vrot.lane.b32.xlu0 %v1350_v38, %s2263_s12 }
0x2131   :  { %v1353_v41 = vpop.permute.xlu0 %1352 }
0x2132   :  { %v1355_v44 = vadd.f32 %v1353_v41, %v1345_v40 }
0x2134   :  { %2215 = vtanh.f32 %v1355_v44 }
0x213e   :  { %v2216_v53 = vpop.eup %2215 }
0x213f   :  { %1358 = vrot.lane.b32.xlu1 %v2216_v53, %s2262_s11 }
0x21b1   :  { %v1359_v45 = vpop.permute.xlu1 %1358 }
0x21b2   :  { %v1361_v47 = vmul.f32 %v1359_v45, %v1344_v29 }
0x21b4   :  { %v1363_v18 = vpack.c.bf16 %v1361_v47, %v1361_v47 }
0x21b6   :  { %1365 = vrot.lane.b32.xlu0 %v1363_v18, %s2263_s12 }
0x2228   :  { %v1366_v13 = vpop.permute.xlu0 %1365 }
0x2229   :  { %2082 = vmatmul.mubr.msk.bf16.vlgmr.msra.gmra.mrb[32].mxu1 %vm77_vm0, %v1366_v13 }
0x222a   :  { %2094 = vmatpush3.bf16.msra.mxu1 %v2563_v50  ;;  %2097 = vmatprep.mubr.msk.bf16.mxu1 %vm2260_vm1, %v2259_v1 }
0x222b   :  { %2095 = vmatprep.subr.bf16.mxu1 %v2259_v1 }
0x222e   :  { %2096 = vmatpush3.bf16.msra.mxu1 %v2571_v51 }
0x222f   :  { %2109 = vmatprep.subr.bf16.mxu1 %v2259_v1 }
0x22fc   :  { %v1404_v48 = vpop.f32.mrb[32].mxu1 }
0x22fd   :  { %v1410_v49 = vadd.f32 %v1404_v48, %v948_v9  ;;  %v2083_v52 = vpop.f32.mrb[33].mxu1 }
0x22fe   :  { %v1407_v2 = vpop.f32.mrb[34].mxu1 }
0x22ff   :  { %v1411_v11 = vmul.f32 2.0, %v1410_v49  ;;  %v2084_v56 = vpop.f32.mrb[35].mxu1 }
0x2301   :  { %v1412_v50 = vsel %vm2379_vm4, %v1411_v11, %v1410_v49 }
0x2302   :  { %v1864_v4 = vmul.f32 -1.442695, %v1412_v50 }
0x2304   :  { %2217 = vpow2.f32 %v1864_v4  ;;  %v2135_v4 = vld [vmem:[%s2795_s4] sm:$0xff]  }
0x230e   :  { %v2218_v43 = vpop.eup %2217 }
0x230f   :  { %v1416_v39 = vadd.f32 1.0, %v2218_v43 }
0x2311   :  { %2219 = vrcp.f32 %v1416_v39  ;;  %v2137_v39 = vld [vmem:[%s2797_s6] sm:$0xff]  }
0x231b   :  { %v2220_v51 = vpop.eup %2219 }
0x231c   :  { %v1419_v57 = vmul.f32 2.0, %v2220_v51 }
0x231e   :  { %v1865_v58 = vadd.f32 -1.0, %v1419_v57 }
0x2320   :  { %v1421_v31 = vsel %vm2379_vm4, %v1865_v58, %v2220_v51 }
0x2321   :  { %1424 = vrot.lane.b32.xlu1 %v1421_v31, %s2262_s11  ;;  %v1422_v61 = vmul.f32 %v1421_v31, %v1355_v44 }
0x2393   :  { %v1425_v21 = vpop.permute.xlu1 %1424 }
0x2394   :  { %v1427_v60 = vmul.f32 %v1425_v21, %v1421_v31 }
0x2396   :  { %1429 = vrot.lane.b32.xlu0 %v1427_v60, %s2263_s12  ;;  %v2138_v60 = vld [vmem:[%s2799_s8] sm:$0xff]  }
0x2408   :  { %v1430_v55 = vpop.permute.xlu0 %1429 }
0x2409   :  { %v1432_v62 = vadd.f32 %v1430_v55, %v1422_v61  ;;  %v1872_v61 = vld [vmem:[%s2796_s5] ss:$0 sm:$0xff] }
0x240b   :  { %2221 = vtanh.f32 %v1432_v62 }
0x2415   :  { %v2222_v20 = vpop.eup %2221 }
0x2416   :  { %1435 = vrot.lane.b32.xlu1 %v2222_v20, %s2262_s11 }
0x2488   :  { %v1436_v63 = vpop.permute.xlu1 %1435 }
0x2489   :  { %v1438_v0 = vmul.f32 %v1436_v63, %v1421_v31 }
0x248b   :  { %v1440_v54 = vpack.c.bf16 %v1438_v0, %v1438_v0 }
0x248d   :  { %1442 = vrot.lane.b32.xlu0 %v1440_v54, %s2263_s12 }
0x24ff   :  { %v1443_v5 = vpop.permute.xlu0 %1442 }
0x2500   :  { %2090 = vmatmul.mubr.msk.bf16.vlgmr.msra.gmra.mrb[36].mxu0 %vm77_vm0, %v1443_v5 }
0x2501   :  { %2105 = vmatprep.mubr.msk.bf16.mxu0 %vm2260_vm1, %v2259_v1  ;;  %2102 = vmatpush3.bf16.msra.mxu0 %v2135_v4 }
0x2502   :  { %2103 = vmatprep.subr.bf16.mxu0 %v2259_v1 }
0x2505   :  { %2104 = vmatpush3.bf16.msra.mxu0 %v2136_v25 }
0x2506   :  { %2115 = vmatprep.subr.bf16.mxu0 %v2259_v1 }
0x25d3   :  { %v1481_v19 = vpop.f32.mrb[36].mxu0 }
0x25d4   :  { %v1487_v6 = vadd.f32 %v1481_v19, %v953_v14  ;;  %v2091_v7 = vpop.f32.mrb[37].mxu0 }
0x25d5   :  { %v1484_v8 = vpop.f32.mrb[38].mxu0 }
0x25d6   :  { %v1488_v10 = vmul.f32 2.0, %v1487_v6  ;;  %v2092_v12 = vpop.f32.mrb[39].mxu0 }
0x25d8   :  { %v1489_v16 = vsel %vm2379_vm4, %v1488_v10, %v1487_v6  ;;  %v1879_v10 = vld [vmem:[%s2800_s9] ss:$0 sm:$0xff] }
0x25d9   :  { %v1867_v22 = vmul.f32 -1.442695, %v1489_v16 }
0x25db   :  { %2223 = vpow2.f32 %v1867_v22 }
0x25e5   :  { %v2224_v23 = vpop.eup %2223 }
0x25e6   :  { %v1493_v3 = vadd.f32 1.0, %v2224_v23 }
0x25e8   :  { %2225 = vrcp.f32 %v1493_v3 }
0x25f2   :  { %v2226_v24 = vpop.eup %2225 }
0x25f3   :  { %v1496_v26 = vmul.f32 2.0, %v2226_v24 }
0x25f5   :  { %v1868_v27 = vadd.f32 -1.0, %v1496_v26 }
0x25f7   :  { %v1498_v28 = vsel %vm2379_vm4, %v1868_v27, %v2226_v24 }
0x25f8   :  { %1501 = vrot.lane.b32.xlu1 %v1498_v28, %s2262_s11  ;;  %v1499_v33 = vmul.f32 %v1498_v28, %v1432_v62 }
0x266a   :  { %v1502_v17 = vpop.permute.xlu1 %1501 }
0x266b   :  { %v1504_v32 = vmul.f32 %v1502_v17, %v1498_v28 }
0x266d   :  { %1506 = vrot.lane.b32.xlu0 %v1504_v32, %s2263_s12 }
0x26df   :  { %v1507_v34 = vpop.permute.xlu0 %1506 }
0x26e0   :  { %v1509_v35 = vadd.f32 %v1507_v34, %v1499_v33 }
0x26e2   :  { %2227 = vtanh.f32 %v1509_v35 }
0x26ec   :  { %v2228_v36 = vpop.eup %2227 }
0x26ed   :  { %1512 = vrot.lane.b32.xlu1 %v2228_v36, %s2262_s11 }
0x275f   :  { %v1513_v37 = vpop.permute.xlu1 %1512 }
0x2760   :  { %v1515_v15 = vmul.f32 %v1513_v37, %v1498_v28 }
0x2762   :  { %v1517_v42 = vpack.c.bf16 %v1515_v15, %v1515_v15 }
0x2764   :  { %1519 = vrot.lane.b32.xlu0 %v1517_v42, %s2263_s12 }
0x27d6   :  { %v1520_v29 = vpop.permute.xlu0 %1519 }
0x27d7   :  { %2098 = vmatmul.mubr.msk.bf16.vlgmr.msra.gmra.mrb[36].mxu1 %vm77_vm0, %v1520_v29 }
0x27d8   :  { %2111 = vmatprep.mubr.msk.bf16.mxu1 %vm2260_vm1, %v2259_v1  ;;  %2110 = vmatpush3.bf16.msra.mxu1 %v2137_v39 }
0x28aa   :  { %v1558_v38 = vpop.f32.mrb[36].mxu1 }
0x28ab   :  { %v1564_v40 = vadd.f32 %v1558_v38, %v956_v46  ;;  %v2099_v41 = vpop.f32.mrb[37].mxu1 }
0x28ac   :  { %v1561_v44 = vpop.f32.mrb[38].mxu1 }
0x28ad   :  { %v1565_v53 = vmul.f32 2.0, %v1564_v40  ;;  %v2100_v45 = vpop.f32.mrb[39].mxu1 }
0x28af   :  { %v1566_v47 = vsel %vm2379_vm4, %v1565_v53, %v1564_v40 }
0x28b0   :  { %v1870_v18 = vmul.f32 -1.442695, %v1566_v47 }
0x28b2   :  { %2229 = vpow2.f32 %v1870_v18 }
0x28bc   :  { %v2230_v13 = vpop.eup %2229 }
0x28bd   :  { %v1570_v9 = vadd.f32 1.0, %v2230_v13 }
0x28bf   :  { %2231 = vrcp.f32 %v1570_v9 }
0x28c9   :  { %v2232_v48 = vpop.eup %2231 }
0x28ca   :  { %v1573_v49 = vmul.f32 2.0, %v2232_v48 }
0x28cc   :  { %v1871_v52 = vadd.f32 -1.0, %v1573_v49 }
0x28ce   :  { %v1575_v59 = vsel %vm2379_vm4, %v1871_v52, %v2232_v48 }
0x28cf   :  { %1578 = vrot.lane.b32.xlu1 %v1575_v59, %s2262_s11  ;;  %v1576_v11 = vmul.f32 %v1575_v59, %v1509_v35 }
0x2941   :  { %v1579_v30 = vpop.permute.xlu1 %1578 }
0x2942   :  { %v1581_v2 = vmul.f32 %v1579_v30, %v1575_v59 }
0x2944   :  { %1583 = vrot.lane.b32.xlu0 %v1581_v2, %s2263_s12 }
0x29b6   :  { %v1584_v56 = vpop.permute.xlu0 %1583 }
0x29b7   :  { %v1586_v50 = vadd.f32 %v1584_v56, %v1576_v11 }
0x29b9   :  { %2233 = vtanh.f32 %v1586_v50 }
0x29c3   :  { %v2234_v43 = vpop.eup %2233 }
0x29c4   :  { %1589 = vrot.lane.b32.xlu1 %v2234_v43, %s2262_s11 }
0x2a36   :  { %v1590_v51 = vpop.permute.xlu1 %1589 }
0x2a37   :  { %v1592_v57 = vmul.f32 %v1590_v51, %v1575_v59 }
0x2a39   :  { %v1593_v58 = vmax.f32 %v1592_v57, 0.0 }
0x2a3b   :  { %v1594_v31 = vpack.c.bf16 %v1593_v58, %v1593_v58 }
0x2a3d   :  { %1607 = vrot.lane.b32.xlu0 %v1594_v31, %s2263_s12 }
0x2aaf   :  { %v1608_v21 = vpop.permute.xlu0 %1607 }
0x2ab0   :  { %2106 = vmatmul.mubr.msk.bf16.vlgmr.msra.gmra.mrb[40].mxu0 %vm77_vm0, %v1608_v21 }
0x2ab1   :  { %2117 = vmatprep.mubr.msk.bf16.mxu0 %vm2260_vm1, %v2259_v1  ;;  %2116 = vmatpush3.bf16.msra.mxu0 %v2138_v60  ;;  %v1876_v1 = vld [vmem:[%s2798_s7] ss:$0 sm:$0xff]  ;;  %s2235_s7 = scalar_lea.vmem %s1792_s18, 32 }
0x2ab2   :  { %p2236_p0 = scmp.ne.s32.totalorder %s1792_s18, %s2235_s7  ;;  %p2241_p2 = scmp.lt.s32.totalorder %s2235_s7, %s2235_s7 }
0x2ab4   :  { %p2242_p3 = por %p2241_p2, %p2240_p1 }
0x2ab6   :  { %p2243_p4 = pnand %p2242_p3, %p2236_p0 }
0x2b83   :  { %v1658_v55 = vpop.f32.mrb[40].mxu0 }
0x2b84   :  { %v1659_v62 = vadd.f32 %v1872_v61, %v1658_v55  ;;  %v2107_v20 = vpop.f32.mrb[41].mxu0 }
0x2b85   :  { %v1661_v63 = vpop.f32.mrb[42].mxu0 }
0x2b86   :  { %v1664_v0 = vpack.c.bf16 %v1659_v62, %v1659_v62  ;;  %v2108_v54 = vpop.f32.mrb[43].mxu0 }
0x2b88   :  { %2112 = vmatmul.mubr.msk.bf16.vlgmr.msra.gmra.mrb[40].mxu1 %vm1680_vm5, %v1664_v0 }
0x2c5b   :  { %v1718_v5 = vpop.f32.mrb[40].mxu1 }
0x2c5c   :  { %v1719_v14 = vadd.f32 %v1876_v1, %v1718_v5  ;;  %v2113_v19 = vpop.f32.mrb[41].mxu1 }
0x2c5d   :  { %v1721_v6 = vpop.f32.mrb[42].mxu1 }
0x2c5e   :  { %v1724_v7 = vpack.c.bf16 %v1719_v14, %v1719_v14  ;;  %v2114_v8 = vpop.f32.mrb[43].mxu1 }
0x2c60   :  { %2118 = vmatmul.mubr.msk.bf16.vlgmr.msra.gmra.mrb[44].mxu0 %vm1680_vm5, %v1724_v7 }
0x2d33   :  { %v1777_v12 = vpop.f32.mrb[44].mxu0 }
0x2d34   :  { %v1778_v16 = vadd.f32 %v1879_v10, %v1777_v12  ;;  %v2119_v22 = vpop.f32.mrb[45].mxu0 }
0x2d35   :  { %v1780_v23 = vpop.f32.mrb[46].mxu0 }
0x2d36   :  { %v2120_v3 = vpop.f32.mrb[47].mxu0  ;;  %1784 = vst.msk [vmem:[#allocation4] sm:$0x3] %vm1783_vm6, %v1778_v16 }
0x2d37   :  { %2246 = shalt.err (!%p2243_p4)
}
0x2d38   :  { %s2247_s9 = scalar_lea.hbm %s2801_s10, 32 }
0x2d39   :  { %p2248_p5 = scmp.ne.s32.totalorder %s2801_s10, %s2247_s9  ;;  %p2251_p6 = scmp.lt.u32.totalorder %s2247_s9, %s2801_s10 }
0x2d3b   :  { %p2253_p7 = pnand %p2251_p6, %p2248_p5 }
0x2d3d   :  { %2256 = shalt.err (!%p2253_p7)
}
0x2d3e   :  { %1794 = dma.vmem_to_hbm [thread:$0]  %s1792_s18, 32, %s2801_s10, [#allocation5]  }
0x2d3f   :  { %2257 = dma.done.wait [#allocation5], 32  }
0x2d40   :  { %2258 = vsyncadd [#allocation5], 4294967264 }
0x2d41   :  { %1798 = vsyncpa [#allocation5], 1 }

</bundles_post_ra>
